<compile_context>
chip_gen: v7x
topology: tpu7x:2x2x1
jax: 0.10.0
libtpu: 0.0.40
codegen_flags: <defaults>
</compile_context>

<pallas_src>
import functools

import numpy as np
import jax
import jax.numpy as jnp
from jax import lax
from jax.experimental import pallas as pl
from jax.experimental.pallas import tpu as pltpu

SIX = 6
LUT_SIZE = 2 ** SIX  # 64
EPS = 1e-7           # only used by the pure-JAX reference (log-guard)


def build_p_q_2_lut_table() -> jnp.ndarray:
    """Deterministic (12, 64) selection table (used by the pure-JAX reference)."""
    table = np.zeros((SIX * 2, LUT_SIZE), dtype=np.float32)
    for i in range(LUT_SIZE):
        bins = ("{0:0%db}" % SIX).format(i)
        for j in range(SIX):
            if bins[j] == "0":
                table[j + SIX, i] = 1.0
            else:
                table[j, i] = 1.0
    return jnp.asarray(table)


def lut_kernel(x_ref, w_ref, out_ref, *, lane_chunk):
    # x_ref:   (6, bt, tn)  inputs, N on lanes
    # w_ref:   (64, tn)     sigmoid(lut) transposed, N on lanes
    # out_ref: (bt, tn)     lane-dense output slab
    _, bt, tn = x_ref.shape
    C = lane_chunk
    n_row_chunks = bt // 8
    n_lane_chunks = tn // C
    n_chunks = n_row_chunks * n_lane_chunks

    def chunk_body(step, carry):
        # Sub-tile offsets: 8 sublane rows x C lanes per iteration.  A real
        # (non-unrolled) loop boundary bounds the vreg live range to one
        # sub-tile's worth of slabs (~24), eliminating spills.
        if n_row_chunks == 1:
            roff = 0
            loff = pl.multiple_of(step * C, C)
        else:
            roff = pl.multiple_of((step % n_row_chunks) * 8, 8)
            loff = pl.multiple_of((step // n_row_chunks) * C, C)

        # Per-bit factors (eps dropped: no log anymore, deviation O(1e-7)).
        p_bit0 = []  # factor when bit_j(i) == 0  ->  relu(x_j)
        p_bit1 = []  # factor when bit_j(i) == 1  ->  relu(1 - x_j)
        for j in range(SIX):
            xj = x_ref[j, pl.ds(roff, 8), pl.ds(loff, C)]       # (8, C)
            p_bit0.append(jnp.maximum(xj, 0.0))
            p_bit1.append(jnp.maximum(1.0 - xj, 0.0))

        def tree3(j0):
            # Partial products over bits (j0, j0+1, j0+2), MSB-first:
            # index m = b_{j0}*4 + b_{j0+1}*2 + b_{j0+2}
            acc = [p_bit0[j0], p_bit1[j0]]
            for j in (j0 + 1, j0 + 2):
                acc = [t for s in acc for t in (s * p_bit0[j], s * p_bit1[j])]
            return acc  # 8 slabs of (8, C)

        hi = tree3(0)  # a = b0*4 + b1*2 + b2
        lo = tree3(3)  # c = b3*4 + b4*2 + b5   (LUT entry i = a*8 + c)

        # output = sum_i lut_p[..., i] * w[i] as lane-dense slab accumulation;
        # w slices use static first indices (sublane-broadcast loads).
        out = None
        for a in range(8):
            s = lo[0] * w_ref[pl.ds(a * 8, 1), pl.ds(loff, C)]   # (1, C) bcast
            for c in range(1, 8):
                s = s + lo[c] * w_ref[pl.ds(a * 8 + c, 1), pl.ds(loff, C)]
            term = hi[a] * s
            out = term if out is None else out + term

        out_ref[pl.ds(roff, 8), pl.ds(loff, C)] = out
        return carry

    lax.fori_loop(0, n_chunks, chunk_body, 0)


def _round_up(x: int, m: int) -> int:
    return ((x + m - 1) // m) * m


def _pick_tile_b(b_pad: int) -> int:
    """Largest of {32, 16, 8} dividing b_pad (b_pad is a multiple of 8)."""
    for bt in (32, 16, 8):
        if b_pad % bt == 0:
            return bt
    return 8  # unreachable: b_pad % 8 == 0


def _pick_tile_n(n_pad: int, bt: int, b_tiles: int,
                 max_block_bytes: int = 6 * 1024 * 1024) -> int:
    """Largest lane-dense N tile dividing n_pad under a per-step VMEM budget.

    Prefers >= 2 total grid steps (so both v7x TensorCores get work) when that
    is achievable, otherwise accepts a single big step.
    """
    cands = [t for t in (8192, 4096, 2048, 1024, 512, 256, 128)
             if n_pad % t == 0 and 4 * t * (7 * bt + LUT_SIZE) <= max_block_bytes]
    if not cands:
        return 128
    if b_tiles >= 2:
        return cands[0]
    for t in cands:
        if n_pad // t >= 2:
            return t
    return cands[0]


def lut_layer(inputs: jnp.ndarray, lut: jnp.ndarray,
              *, tn: int | None = None, bt: int | None = None) -> jnp.ndarray:
    """Pallas implementation of LutLayer.forward.

    inputs: (B, N, 6) float32 probabilities, lut: (N, 64) float32 logits
    -> (B, N) float32.
    """
    B, N, S = inputs.shape
    assert S == SIX
    assert lut.shape == (N, LUT_SIZE)

    # Layout plumbing (outside the kernel): N on the lane axis.
    # TODO(synk): produce activations in (6, B, N) upstream and cache w_t when
    # lut is reused across calls to avoid these transposes' HBM round trips.
    x_t = jnp.transpose(inputs.astype(jnp.float32), (2, 0, 1))        # (6, B, N)
    w_t = jnp.transpose(jax.nn.sigmoid(lut.astype(jnp.float32)))      # (64, N)

    # Pad B to a multiple of 8 (sublane) and N to a multiple of 128 (lane).
    B_pad = _round_up(max(B, 1), 8)
    N_pad = _round_up(N, 128)
    if B_pad != B or N_pad != N:
        x_t = jnp.pad(x_t, ((0, 0), (0, B_pad - B), (0, N_pad - N)))
    if N_pad != N:
        w_t = jnp.pad(w_t, ((0, 0), (0, N_pad - N)))

    if bt is None:
        bt = _pick_tile_b(B_pad)
    if tn is None:
        tn = _pick_tile_n(N_pad, bt, B_pad // bt)
    assert B_pad % bt == 0 and bt % 8 == 0
    assert N_pad % tn == 0 and tn % 128 == 0

    lane_chunk = 256 if tn % 256 == 0 else 128

    # B innermost so the w block index is constant across the inner sweep and
    # Pallas skips re-fetching the (64, tn) w block.
    grid = (N_pad // tn, B_pad // bt)

    # VMEM budget: double-buffered blocks + slack, capped for v7x (64 MiB
    # physical).  In-kernel live state is tiny now (sub-tiled), so 4x the
    # per-step block bytes is comfortably sufficient.
    block_bytes = 4 * tn * (SIX * bt + LUT_SIZE + bt)
    vmem_limit = min(48 * 1024 * 1024, max(16 * 1024 * 1024, 4 * block_bytes))

    out = pl.pallas_call(
        functools.partial(lut_kernel, lane_chunk=lane_chunk),
        out_shape=jax.ShapeDtypeStruct((B_pad, N_pad), jnp.float32),
        grid_spec=pltpu.PrefetchScalarGridSpec(
            num_scalar_prefetch=0,
            grid=grid,
            in_specs=[
                pl.BlockSpec((SIX, bt, tn), lambda ni, bi: (0, bi, ni)),
                pl.BlockSpec((LUT_SIZE, tn), lambda ni, bi: (0, ni)),
            ],
            out_specs=pl.BlockSpec((bt, tn), lambda ni, bi: (bi, ni)),
        ),
        compiler_params=pltpu.CompilerParams(
            dimension_semantics=("parallel", "parallel"),
            vmem_limit_bytes=vmem_limit,
        ),
    )(x_t, w_t)

    return out[:B, :N]


def lut_layer_reference(inputs, lut, table):
    """Pure-JAX reference mirroring the PyTorch forward exactly (incl. eps)."""
    p_q = jnp.concatenate([1.0 - inputs, inputs], axis=-1)       # (B, N, 12)
    p_q = jnp.maximum(p_q, 0.0) + EPS
    lut_p = jnp.exp(jnp.log(p_q) @ table)                        # (B, N, 64)
    return jnp.sum(lut_p * jax.nn.sigmoid(lut)[None], axis=-1)   # (B, N)


# TODO(synk): LutLayer.infer (integer bit-packed gather path) is not part of
# forward() and is not implemented here.

if __name__ == "__main__":
    table = build_p_q_2_lut_table()
    key = jax.random.PRNGKey(0)

    # Main demo shape: batch=2, 1024 LUTs of 6 inputs each.
    B, N = 2, 1024
    k_in, k_lut, k_in2, k_lut2 = jax.random.split(key, 4)
    inputs = jax.random.uniform(k_in, (B, N, SIX), dtype=jnp.float32)
    lut = jax.random.normal(k_lut, (N, LUT_SIZE), dtype=jnp.float32)

    out = jax.block_until_ready(lut_layer(inputs, lut))
    ref = lut_layer_reference(inputs, lut, table)
    assert out.shape == (B, N)
    assert np.allclose(np.asarray(out), np.asarray(ref), atol=1e-4, rtol=1e-4)

    # Second, awkwardly-shaped check to exercise the B/N padding path.
    B2, N2 = 5, 200
    inputs2 = jax.random.uniform(k_in2, (B2, N2, SIX), dtype=jnp.float32)
    lut2 = jax.random.normal(k_lut2, (N2, LUT_SIZE), dtype=jnp.float32)
    out2 = jax.block_until_ready(lut_layer(inputs2, lut2))
    ref2 = lut_layer_reference(inputs2, lut2, table)
    assert out2.shape == (B2, N2)
    assert np.allclose(np.asarray(out2), np.asarray(ref2), atol=1e-4, rtol=1e-4)

    print("KERNEL_OK")
</pallas_src>

<mosaic_0001>
module attributes {stable_mosaic.version = 11 : i64} {
  func.func @lut_kernel(%arg0: i32, %arg1: i32, %arg2: memref<6x8x512xf32, #tpu.memory_space<vmem>>, %arg3: memref<64x512xf32, #tpu.memory_space<vmem>>, %arg4: memref<8x512xf32, #tpu.memory_space<vmem>>) attributes {dimension_semantics = [#tpu.dimension_semantics<parallel>, #tpu.dimension_semantics<parallel>], iteration_bounds = array<i64: 2, 1>, scalar_prefetch = 0 : i64, scratch_operands = 0 : i64, tpu.core_type = #tpu.core_type<tc>, window_params = [{transform_indices = @transform_0, window_bounds = array<i64: 6, 8, 512>}, {transform_indices = @transform_1, window_bounds = array<i64: 64, 512>}, {transform_indices = @transform_2, window_bounds = array<i64: 8, 512>}]} {
    %c0_i32 = arith.constant 0 : i32
    %c2_i32 = arith.constant 2 : i32
    %0 = arith.addi %c0_i32, %c2_i32 : i32
    %c1_i32 = arith.constant 1 : i32
    scf.for %arg5 = %c0_i32 to %0 step %c1_i32  : i32 {
      %c256_i32 = arith.constant 256 : i32
      %1 = arith.muli %arg5, %c256_i32 : i32
      %2 = tpu.assume_multiple %1, 256 : i32
      %c0 = arith.constant 0 : index
      %c0_1 = arith.constant 0 : index
      %3 = arith.index_cast %2 : i32 to index
      %4 = vector.load %arg2[%c0, %c0_1, %3] : memref<6x8x512xf32, #tpu.memory_space<vmem>>, vector<1x8x256xf32>
      %5 = vector.shape_cast %4 : vector<1x8x256xf32> to vector<8x256xf32>
      %cst = arith.constant 0.000000e+00 : f32
      %6 = vector.broadcast %cst : f32 to vector<8x256xf32>
      %7 = arith.maximumf %5, %6 : vector<8x256xf32>
      %cst_2 = arith.constant 1.000000e+00 : f32
      %8 = vector.broadcast %cst_2 : f32 to vector<8x256xf32>
      %9 = arith.subf %8, %5 : vector<8x256xf32>
      %cst_3 = arith.constant 0.000000e+00 : f32
      %10 = vector.broadcast %cst_3 : f32 to vector<8x256xf32>
      %11 = arith.maximumf %9, %10 : vector<8x256xf32>
      %c1 = arith.constant 1 : index
      %c0_4 = arith.constant 0 : index
      %12 = arith.index_cast %2 : i32 to index
      %13 = vector.load %arg2[%c1, %c0_4, %12] : memref<6x8x512xf32, #tpu.memory_space<vmem>>, vector<1x8x256xf32>
      %14 = vector.shape_cast %13 : vector<1x8x256xf32> to vector<8x256xf32>
      %cst_5 = arith.constant 0.000000e+00 : f32
      %15 = vector.broadcast %cst_5 : f32 to vector<8x256xf32>
      %16 = arith.maximumf %14, %15 : vector<8x256xf32>
      %cst_6 = arith.constant 1.000000e+00 : f32
      %17 = vector.broadcast %cst_6 : f32 to vector<8x256xf32>
      %18 = arith.subf %17, %14 : vector<8x256xf32>
      %cst_7 = arith.constant 0.000000e+00 : f32
      %19 = vector.broadcast %cst_7 : f32 to vector<8x256xf32>
      %20 = arith.maximumf %18, %19 : vector<8x256xf32>
      %c2 = arith.constant 2 : index
      %c0_8 = arith.constant 0 : index
      %21 = arith.index_cast %2 : i32 to index
      %22 = vector.load %arg2[%c2, %c0_8, %21] : memref<6x8x512xf32, #tpu.memory_space<vmem>>, vector<1x8x256xf32>
      %23 = vector.shape_cast %22 : vector<1x8x256xf32> to vector<8x256xf32>
      %cst_9 = arith.constant 0.000000e+00 : f32
      %24 = vector.broadcast %cst_9 : f32 to vector<8x256xf32>
      %25 = arith.maximumf %23, %24 : vector<8x256xf32>
      %cst_10 = arith.constant 1.000000e+00 : f32
      %26 = vector.broadcast %cst_10 : f32 to vector<8x256xf32>
      %27 = arith.subf %26, %23 : vector<8x256xf32>
      %cst_11 = arith.constant 0.000000e+00 : f32
      %28 = vector.broadcast %cst_11 : f32 to vector<8x256xf32>
      %29 = arith.maximumf %27, %28 : vector<8x256xf32>
      %c3 = arith.constant 3 : index
      %c0_12 = arith.constant 0 : index
      %30 = arith.index_cast %2 : i32 to index
      %31 = vector.load %arg2[%c3, %c0_12, %30] : memref<6x8x512xf32, #tpu.memory_space<vmem>>, vector<1x8x256xf32>
      %32 = vector.shape_cast %31 : vector<1x8x256xf32> to vector<8x256xf32>
      %cst_13 = arith.constant 0.000000e+00 : f32
      %33 = vector.broadcast %cst_13 : f32 to vector<8x256xf32>
      %34 = arith.maximumf %32, %33 : vector<8x256xf32>
      %cst_14 = arith.constant 1.000000e+00 : f32
      %35 = vector.broadcast %cst_14 : f32 to vector<8x256xf32>
      %36 = arith.subf %35, %32 : vector<8x256xf32>
      %cst_15 = arith.constant 0.000000e+00 : f32
      %37 = vector.broadcast %cst_15 : f32 to vector<8x256xf32>
      %38 = arith.maximumf %36, %37 : vector<8x256xf32>
      %c4 = arith.constant 4 : index
      %c0_16 = arith.constant 0 : index
      %39 = arith.index_cast %2 : i32 to index
      %40 = vector.load %arg2[%c4, %c0_16, %39] : memref<6x8x512xf32, #tpu.memory_space<vmem>>, vector<1x8x256xf32>
      %41 = vector.shape_cast %40 : vector<1x8x256xf32> to vector<8x256xf32>
      %cst_17 = arith.constant 0.000000e+00 : f32
      %42 = vector.broadcast %cst_17 : f32 to vector<8x256xf32>
      %43 = arith.maximumf %41, %42 : vector<8x256xf32>
      %cst_18 = arith.constant 1.000000e+00 : f32
      %44 = vector.broadcast %cst_18 : f32 to vector<8x256xf32>
      %45 = arith.subf %44, %41 : vector<8x256xf32>
      %cst_19 = arith.constant 0.000000e+00 : f32
      %46 = vector.broadcast %cst_19 : f32 to vector<8x256xf32>
      %47 = arith.maximumf %45, %46 : vector<8x256xf32>
      %c5 = arith.constant 5 : index
      %c0_20 = arith.constant 0 : index
      %48 = arith.index_cast %2 : i32 to index
      %49 = vector.load %arg2[%c5, %c0_20, %48] : memref<6x8x512xf32, #tpu.memory_space<vmem>>, vector<1x8x256xf32>
      %50 = vector.shape_cast %49 : vector<1x8x256xf32> to vector<8x256xf32>
      %cst_21 = arith.constant 0.000000e+00 : f32
      %51 = vector.broadcast %cst_21 : f32 to vector<8x256xf32>
      %52 = arith.maximumf %50, %51 : vector<8x256xf32>
      %cst_22 = arith.constant 1.000000e+00 : f32
      %53 = vector.broadcast %cst_22 : f32 to vector<8x256xf32>
      %54 = arith.subf %53, %50 : vector<8x256xf32>
      %cst_23 = arith.constant 0.000000e+00 : f32
      %55 = vector.broadcast %cst_23 : f32 to vector<8x256xf32>
      %56 = arith.maximumf %54, %55 : vector<8x256xf32>
      %57 = arith.mulf %7, %16 : vector<8x256xf32>
      %58 = arith.mulf %7, %20 : vector<8x256xf32>
      %59 = arith.mulf %11, %16 : vector<8x256xf32>
      %60 = arith.mulf %11, %20 : vector<8x256xf32>
      %61 = arith.mulf %57, %25 : vector<8x256xf32>
      %62 = arith.mulf %57, %29 : vector<8x256xf32>
      %63 = arith.mulf %58, %25 : vector<8x256xf32>
      %64 = arith.mulf %58, %29 : vector<8x256xf32>
      %65 = arith.mulf %59, %25 : vector<8x256xf32>
      %66 = arith.mulf %59, %29 : vector<8x256xf32>
      %67 = arith.mulf %60, %25 : vector<8x256xf32>
      %68 = arith.mulf %60, %29 : vector<8x256xf32>
      %69 = arith.mulf %34, %43 : vector<8x256xf32>
      %70 = arith.mulf %34, %47 : vector<8x256xf32>
      %71 = arith.mulf %38, %43 : vector<8x256xf32>
      %72 = arith.mulf %38, %47 : vector<8x256xf32>
      %73 = arith.mulf %69, %52 : vector<8x256xf32>
      %74 = arith.mulf %69, %56 : vector<8x256xf32>
      %75 = arith.mulf %70, %52 : vector<8x256xf32>
      %76 = arith.mulf %70, %56 : vector<8x256xf32>
      %77 = arith.mulf %71, %52 : vector<8x256xf32>
      %78 = arith.mulf %71, %56 : vector<8x256xf32>
      %79 = arith.mulf %72, %52 : vector<8x256xf32>
      %80 = arith.mulf %72, %56 : vector<8x256xf32>
      %c0_24 = arith.constant 0 : index
      %81 = arith.index_cast %2 : i32 to index
      %82 = vector.load %arg3[%c0_24, %81] : memref<64x512xf32, #tpu.memory_space<vmem>>, vector<1x256xf32>
      %83 = vector.broadcast %82 : vector<1x256xf32> to vector<8x256xf32>
      %84 = arith.mulf %73, %83 : vector<8x256xf32>
      %c1_25 = arith.constant 1 : index
      %85 = arith.index_cast %2 : i32 to index
      %86 = vector.load %arg3[%c1_25, %85] : memref<64x512xf32, #tpu.memory_space<vmem>>, vector<1x256xf32>
      %87 = vector.broadcast %86 : vector<1x256xf32> to vector<8x256xf32>
      %88 = arith.mulf %74, %87 : vector<8x256xf32>
      %89 = arith.addf %84, %88 : vector<8x256xf32>
      %c2_26 = arith.constant 2 : index
      %90 = arith.index_cast %2 : i32 to index
      %91 = vector.load %arg3[%c2_26, %90] : memref<64x512xf32, #tpu.memory_space<vmem>>, vector<1x256xf32>
      %92 = vector.broadcast %91 : vector<1x256xf32> to vector<8x256xf32>
      %93 = arith.mulf %75, %92 : vector<8x256xf32>
      %94 = arith.addf %89, %93 : vector<8x256xf32>
      %c3_27 = arith.constant 3 : index
      %95 = arith.index_cast %2 : i32 to index
      %96 = vector.load %arg3[%c3_27, %95] : memref<64x512xf32, #tpu.memory_space<vmem>>, vector<1x256xf32>
      %97 = vector.broadcast %96 : vector<1x256xf32> to vector<8x256xf32>
      %98 = arith.mulf %76, %97 : vector<8x256xf32>
      %99 = arith.addf %94, %98 : vector<8x256xf32>
      %c4_28 = arith.constant 4 : index
      %100 = arith.index_cast %2 : i32 to index
      %101 = vector.load %arg3[%c4_28, %100] : memref<64x512xf32, #tpu.memory_space<vmem>>, vector<1x256xf32>
      %102 = vector.broadcast %101 : vector<1x256xf32> to vector<8x256xf32>
      %103 = arith.mulf %77, %102 : vector<8x256xf32>
      %104 = arith.addf %99, %103 : vector<8x256xf32>
      %c5_29 = arith.constant 5 : index
      %105 = arith.index_cast %2 : i32 to index
      %106 = vector.load %arg3[%c5_29, %105] : memref<64x512xf32, #tpu.memory_space<vmem>>, vector<1x256xf32>
      %107 = vector.broadcast %106 : vector<1x256xf32> to vector<8x256xf32>
      %108 = arith.mulf %78, %107 : vector<8x256xf32>
      %109 = arith.addf %104, %108 : vector<8x256xf32>
      %c6 = arith.constant 6 : index
      %110 = arith.index_cast %2 : i32 to index
      %111 = vector.load %arg3[%c6, %110] : memref<64x512xf32, #tpu.memory_space<vmem>>, vector<1x256xf32>
      %112 = vector.broadcast %111 : vector<1x256xf32> to vector<8x256xf32>
      %113 = arith.mulf %79, %112 : vector<8x256xf32>
      %114 = arith.addf %109, %113 : vector<8x256xf32>
      %c7 = arith.constant 7 : index
      %115 = arith.index_cast %2 : i32 to index
      %116 = vector.load %arg3[%c7, %115] : memref<64x512xf32, #tpu.memory_space<vmem>>, vector<1x256xf32>
      %117 = vector.broadcast %116 : vector<1x256xf32> to vector<8x256xf32>
      %118 = arith.mulf %80, %117 : vector<8x256xf32>
      %119 = arith.addf %114, %118 : vector<8x256xf32>
      %120 = arith.mulf %61, %119 : vector<8x256xf32>
      %c8 = arith.constant 8 : index
      %121 = arith.index_cast %2 : i32 to index
      %122 = vector.load %arg3[%c8, %121] : memref<64x512xf32, #tpu.memory_space<vmem>>, vector<1x256xf32>
      %123 = vector.broadcast %122 : vector<1x256xf32> to vector<8x256xf32>
      %124 = arith.mulf %73, %123 : vector<8x256xf32>
      %c9 = arith.constant 9 : index
      %125 = arith.index_cast %2 : i32 to index
      %126 = vector.load %arg3[%c9, %125] : memref<64x512xf32, #tpu.memory_space<vmem>>, vector<1x256xf32>
      %127 = vector.broadcast %126 : vector<1x256xf32> to vector<8x256xf32>
      %128 = arith.mulf %74, %127 : vector<8x256xf32>
      %129 = arith.addf %124, %128 : vector<8x256xf32>
      %c10 = arith.constant 10 : index
      %130 = arith.index_cast %2 : i32 to index
      %131 = vector.load %arg3[%c10, %130] : memref<64x512xf32, #tpu.memory_space<vmem>>, vector<1x256xf32>
      %132 = vector.broadcast %131 : vector<1x256xf32> to vector<8x256xf32>
      %133 = arith.mulf %75, %132 : vector<8x256xf32>
      %134 = arith.addf %129, %133 : vector<8x256xf32>
      %c11 = arith.constant 11 : index
      %135 = arith.index_cast %2 : i32 to index
      %136 = vector.load %arg3[%c11, %135] : memref<64x512xf32, #tpu.memory_space<vmem>>, vector<1x256xf32>
      %137 = vector.broadcast %136 : vector<1x256xf32> to vector<8x256xf32>
      %138 = arith.mulf %76, %137 : vector<8x256xf32>
      %139 = arith.addf %134, %138 : vector<8x256xf32>
      %c12 = arith.constant 12 : index
      %140 = arith.index_cast %2 : i32 to index
      %141 = vector.load %arg3[%c12, %140] : memref<64x512xf32, #tpu.memory_space<vmem>>, vector<1x256xf32>
      %142 = vector.broadcast %141 : vector<1x256xf32> to vector<8x256xf32>
      %143 = arith.mulf %77, %142 : vector<8x256xf32>
      %144 = arith.addf %139, %143 : vector<8x256xf32>
      %c13 = arith.constant 13 : index
      %145 = arith.index_cast %2 : i32 to index
      %146 = vector.load %arg3[%c13, %145] : memref<64x512xf32, #tpu.memory_space<vmem>>, vector<1x256xf32>
      %147 = vector.broadcast %146 : vector<1x256xf32> to vector<8x256xf32>
      %148 = arith.mulf %78, %147 : vector<8x256xf32>
      %149 = arith.addf %144, %148 : vector<8x256xf32>
      %c14 = arith.constant 14 : index
      %150 = arith.index_cast %2 : i32 to index
      %151 = vector.load %arg3[%c14, %150] : memref<64x512xf32, #tpu.memory_space<vmem>>, vector<1x256xf32>
      %152 = vector.broadcast %151 : vector<1x256xf32> to vector<8x256xf32>
      %153 = arith.mulf %79, %152 : vector<8x256xf32>
      %154 = arith.addf %149, %153 : vector<8x256xf32>
      %c15 = arith.constant 15 : index
      %155 = arith.index_cast %2 : i32 to index
      %156 = vector.load %arg3[%c15, %155] : memref<64x512xf32, #tpu.memory_space<vmem>>, vector<1x256xf32>
      %157 = vector.broadcast %156 : vector<1x256xf32> to vector<8x256xf32>
      %158 = arith.mulf %80, %157 : vector<8x256xf32>
      %159 = arith.addf %154, %158 : vector<8x256xf32>
      %160 = arith.mulf %62, %159 : vector<8x256xf32>
      %161 = arith.addf %120, %160 : vector<8x256xf32>
      %c16 = arith.constant 16 : index
      %162 = arith.index_cast %2 : i32 to index
      %163 = vector.load %arg3[%c16, %162] : memref<64x512xf32, #tpu.memory_space<vmem>>, vector<1x256xf32>
      %164 = vector.broadcast %163 : vector<1x256xf32> to vector<8x256xf32>
      %165 = arith.mulf %73, %164 : vector<8x256xf32>
      %c17 = arith.constant 17 : index
      %166 = arith.index_cast %2 : i32 to index
      %167 = vector.load %arg3[%c17, %166] : memref<64x512xf32, #tpu.memory_space<vmem>>, vector<1x256xf32>
      %168 = vector.broadcast %167 : vector<1x256xf32> to vector<8x256xf32>
      %169 = arith.mulf %74, %168 : vector<8x256xf32>
      %170 = arith.addf %165, %169 : vector<8x256xf32>
      %c18 = arith.constant 18 : index
      %171 = arith.index_cast %2 : i32 to index
      %172 = vector.load %arg3[%c18, %171] : memref<64x512xf32, #tpu.memory_space<vmem>>, vector<1x256xf32>
      %173 = vector.broadcast %172 : vector<1x256xf32> to vector<8x256xf32>
      %174 = arith.mulf %75, %173 : vector<8x256xf32>
      %175 = arith.addf %170, %174 : vector<8x256xf32>
      %c19 = arith.constant 19 : index
      %176 = arith.index_cast %2 : i32 to index
      %177 = vector.load %arg3[%c19, %176] : memref<64x512xf32, #tpu.memory_space<vmem>>, vector<1x256xf32>
      %178 = vector.broadcast %177 : vector<1x256xf32> to vector<8x256xf32>
      %179 = arith.mulf %76, %178 : vector<8x256xf32>
      %180 = arith.addf %175, %179 : vector<8x256xf32>
      %c20 = arith.constant 20 : index
      %181 = arith.index_cast %2 : i32 to index
      %182 = vector.load %arg3[%c20, %181] : memref<64x512xf32, #tpu.memory_space<vmem>>, vector<1x256xf32>
      %183 = vector.broadcast %182 : vector<1x256xf32> to vector<8x256xf32>
      %184 = arith.mulf %77, %183 : vector<8x256xf32>
      %185 = arith.addf %180, %184 : vector<8x256xf32>
      %c21 = arith.constant 21 : index
      %186 = arith.index_cast %2 : i32 to index
      %187 = vector.load %arg3[%c21, %186] : memref<64x512xf32, #tpu.memory_space<vmem>>, vector<1x256xf32>
      %188 = vector.broadcast %187 : vector<1x256xf32> to vector<8x256xf32>
      %189 = arith.mulf %78, %188 : vector<8x256xf32>
      %190 = arith.addf %185, %189 : vector<8x256xf32>
      %c22 = arith.constant 22 : index
      %191 = arith.index_cast %2 : i32 to index
      %192 = vector.load %arg3[%c22, %191] : memref<64x512xf32, #tpu.memory_space<vmem>>, vector<1x256xf32>
      %193 = vector.broadcast %192 : vector<1x256xf32> to vector<8x256xf32>
      %194 = arith.mulf %79, %193 : vector<8x256xf32>
      %195 = arith.addf %190, %194 : vector<8x256xf32>
      %c23 = arith.constant 23 : index
      %196 = arith.index_cast %2 : i32 to index
      %197 = vector.load %arg3[%c23, %196] : memref<64x512xf32, #tpu.memory_space<vmem>>, vector<1x256xf32>
      %198 = vector.broadcast %197 : vector<1x256xf32> to vector<8x256xf32>
      %199 = arith.mulf %80, %198 : vector<8x256xf32>
      %200 = arith.addf %195, %199 : vector<8x256xf32>
      %201 = arith.mulf %63, %200 : vector<8x256xf32>
      %202 = arith.addf %161, %201 : vector<8x256xf32>
      %c24 = arith.constant 24 : index
      %203 = arith.index_cast %2 : i32 to index
      %204 = vector.load %arg3[%c24, %203] : memref<64x512xf32, #tpu.memory_space<vmem>>, vector<1x256xf32>
      %205 = vector.broadcast %204 : vector<1x256xf32> to vector<8x256xf32>
      %206 = arith.mulf %73, %205 : vector<8x256xf32>
      %c25 = arith.constant 25 : index
      %207 = arith.index_cast %2 : i32 to index
      %208 = vector.load %arg3[%c25, %207] : memref<64x512xf32, #tpu.memory_space<vmem>>, vector<1x256xf32>
      %209 = vector.broadcast %208 : vector<1x256xf32> to vector<8x256xf32>
      %210 = arith.mulf %74, %209 : vector<8x256xf32>
      %211 = arith.addf %206, %210 : vector<8x256xf32>
      %c26 = arith.constant 26 : index
      %212 = arith.index_cast %2 : i32 to index
      %213 = vector.load %arg3[%c26, %212] : memref<64x512xf32, #tpu.memory_space<vmem>>, vector<1x256xf32>
      %214 = vector.broadcast %213 : vector<1x256xf32> to vector<8x256xf32>
      %215 = arith.mulf %75, %214 : vector<8x256xf32>
      %216 = arith.addf %211, %215 : vector<8x256xf32>
      %c27 = arith.constant 27 : index
      %217 = arith.index_cast %2 : i32 to index
      %218 = vector.load %arg3[%c27, %217] : memref<64x512xf32, #tpu.memory_space<vmem>>, vector<1x256xf32>
      %219 = vector.broadcast %218 : vector<1x256xf32> to vector<8x256xf32>
      %220 = arith.mulf %76, %219 : vector<8x256xf32>
      %221 = arith.addf %216, %220 : vector<8x256xf32>
      %c28 = arith.constant 28 : index
      %222 = arith.index_cast %2 : i32 to index
      %223 = vector.load %arg3[%c28, %222] : memref<64x512xf32, #tpu.memory_space<vmem>>, vector<1x256xf32>
      %224 = vector.broadcast %223 : vector<1x256xf32> to vector<8x256xf32>
      %225 = arith.mulf %77, %224 : vector<8x256xf32>
      %226 = arith.addf %221, %225 : vector<8x256xf32>
      %c29 = arith.constant 29 : index
      %227 = arith.index_cast %2 : i32 to index
      %228 = vector.load %arg3[%c29, %227] : memref<64x512xf32, #tpu.memory_space<vmem>>, vector<1x256xf32>
      %229 = vector.broadcast %228 : vector<1x256xf32> to vector<8x256xf32>
      %230 = arith.mulf %78, %229 : vector<8x256xf32>
      %231 = arith.addf %226, %230 : vector<8x256xf32>
      %c30 = arith.constant 30 : index
      %232 = arith.index_cast %2 : i32 to index
      %233 = vector.load %arg3[%c30, %232] : memref<64x512xf32, #tpu.memory_space<vmem>>, vector<1x256xf32>
      %234 = vector.broadcast %233 : vector<1x256xf32> to vector<8x256xf32>
      %235 = arith.mulf %79, %234 : vector<8x256xf32>
      %236 = arith.addf %231, %235 : vector<8x256xf32>
      %c31 = arith.constant 31 : index
      %237 = arith.index_cast %2 : i32 to index
      %238 = vector.load %arg3[%c31, %237] : memref<64x512xf32, #tpu.memory_space<vmem>>, vector<1x256xf32>
      %239 = vector.broadcast %238 : vector<1x256xf32> to vector<8x256xf32>
      %240 = arith.mulf %80, %239 : vector<8x256xf32>
      %241 = arith.addf %236, %240 : vector<8x256xf32>
      %242 = arith.mulf %64, %241 : vector<8x256xf32>
      %243 = arith.addf %202, %242 : vector<8x256xf32>
      %c32 = arith.constant 32 : index
      %244 = arith.index_cast %2 : i32 to index
      %245 = vector.load %arg3[%c32, %244] : memref<64x512xf32, #tpu.memory_space<vmem>>, vector<1x256xf32>
      %246 = vector.broadcast %245 : vector<1x256xf32> to vector<8x256xf32>
      %247 = arith.mulf %73, %246 : vector<8x256xf32>
      %c33 = arith.constant 33 : index
      %248 = arith.index_cast %2 : i32 to index
      %249 = vector.load %arg3[%c33, %248] : memref<64x512xf32, #tpu.memory_space<vmem>>, vector<1x256xf32>
      %250 = vector.broadcast %249 : vector<1x256xf32> to vector<8x256xf32>
      %251 = arith.mulf %74, %250 : vector<8x256xf32>
      %252 = arith.addf %247, %251 : vector<8x256xf32>
      %c34 = arith.constant 34 : index
      %253 = arith.index_cast %2 : i32 to index
      %254 = vector.load %arg3[%c34, %253] : memref<64x512xf32, #tpu.memory_space<vmem>>, vector<1x256xf32>
      %255 = vector.broadcast %254 : vector<1x256xf32> to vector<8x256xf32>
      %256 = arith.mulf %75, %255 : vector<8x256xf32>
      %257 = arith.addf %252, %256 : vector<8x256xf32>
      %c35 = arith.constant 35 : index
      %258 = arith.index_cast %2 : i32 to index
      %259 = vector.load %arg3[%c35, %258] : memref<64x512xf32, #tpu.memory_space<vmem>>, vector<1x256xf32>
      %260 = vector.broadcast %259 : vector<1x256xf32> to vector<8x256xf32>
      %261 = arith.mulf %76, %260 : vector<8x256xf32>
      %262 = arith.addf %257, %261 : vector<8x256xf32>
      %c36 = arith.constant 36 : index
      %263 = arith.index_cast %2 : i32 to index
      %264 = vector.load %arg3[%c36, %263] : memref<64x512xf32, #tpu.memory_space<vmem>>, vector<1x256xf32>
      %265 = vector.broadcast %264 : vector<1x256xf32> to vector<8x256xf32>
      %266 = arith.mulf %77, %265 : vector<8x256xf32>
      %267 = arith.addf %262, %266 : vector<8x256xf32>
      %c37 = arith.constant 37 : index
      %268 = arith.index_cast %2 : i32 to index
      %269 = vector.load %arg3[%c37, %268] : memref<64x512xf32, #tpu.memory_space<vmem>>, vector<1x256xf32>
      %270 = vector.broadcast %269 : vector<1x256xf32> to vector<8x256xf32>
      %271 = arith.mulf %78, %270 : vector<8x256xf32>
      %272 = arith.addf %267, %271 : vector<8x256xf32>
      %c38 = arith.constant 38 : index
      %273 = arith.index_cast %2 : i32 to index
      %274 = vector.load %arg3[%c38, %273] : memref<64x512xf32, #tpu.memory_space<vmem>>, vector<1x256xf32>
      %275 = vector.broadcast %274 : vector<1x256xf32> to vector<8x256xf32>
      %276 = arith.mulf %79, %275 : vector<8x256xf32>
      %277 = arith.addf %272, %276 : vector<8x256xf32>
      %c39 = arith.constant 39 : index
      %278 = arith.index_cast %2 : i32 to index
      %279 = vector.load %arg3[%c39, %278] : memref<64x512xf32, #tpu.memory_space<vmem>>, vector<1x256xf32>
      %280 = vector.broadcast %279 : vector<1x256xf32> to vector<8x256xf32>
      %281 = arith.mulf %80, %280 : vector<8x256xf32>
      %282 = arith.addf %277, %281 : vector<8x256xf32>
      %283 = arith.mulf %65, %282 : vector<8x256xf32>
      %284 = arith.addf %243, %283 : vector<8x256xf32>
      %c40 = arith.constant 40 : index
      %285 = arith.index_cast %2 : i32 to index
      %286 = vector.load %arg3[%c40, %285] : memref<64x512xf32, #tpu.memory_space<vmem>>, vector<1x256xf32>
      %287 = vector.broadcast %286 : vector<1x256xf32> to vector<8x256xf32>
      %288 = arith.mulf %73, %287 : vector<8x256xf32>
      %c41 = arith.constant 41 : index
      %289 = arith.index_cast %2 : i32 to index
      %290 = vector.load %arg3[%c41, %289] : memref<64x512xf32, #tpu.memory_space<vmem>>, vector<1x256xf32>
      %291 = vector.broadcast %290 : vector<1x256xf32> to vector<8x256xf32>
      %292 = arith.mulf %74, %291 : vector<8x256xf32>
      %293 = arith.addf %288, %292 : vector<8x256xf32>
      %c42 = arith.constant 42 : index
      %294 = arith.index_cast %2 : i32 to index
      %295 = vector.load %arg3[%c42, %294] : memref<64x512xf32, #tpu.memory_space<vmem>>, vector<1x256xf32>
      %296 = vector.broadcast %295 : vector<1x256xf32> to vector<8x256xf32>
      %297 = arith.mulf %75, %296 : vector<8x256xf32>
      %298 = arith.addf %293, %297 : vector<8x256xf32>
      %c43 = arith.constant 43 : index
      %299 = arith.index_cast %2 : i32 to index
      %300 = vector.load %arg3[%c43, %299] : memref<64x512xf32, #tpu.memory_space<vmem>>, vector<1x256xf32>
      %301 = vector.broadcast %300 : vector<1x256xf32> to vector<8x256xf32>
      %302 = arith.mulf %76, %301 : vector<8x256xf32>
      %303 = arith.addf %298, %302 : vector<8x256xf32>
      %c44 = arith.constant 44 : index
      %304 = arith.index_cast %2 : i32 to index
      %305 = vector.load %arg3[%c44, %304] : memref<64x512xf32, #tpu.memory_space<vmem>>, vector<1x256xf32>
      %306 = vector.broadcast %305 : vector<1x256xf32> to vector<8x256xf32>
      %307 = arith.mulf %77, %306 : vector<8x256xf32>
      %308 = arith.addf %303, %307 : vector<8x256xf32>
      %c45 = arith.constant 45 : index
      %309 = arith.index_cast %2 : i32 to index
      %310 = vector.load %arg3[%c45, %309] : memref<64x512xf32, #tpu.memory_space<vmem>>, vector<1x256xf32>
      %311 = vector.broadcast %310 : vector<1x256xf32> to vector<8x256xf32>
      %312 = arith.mulf %78, %311 : vector<8x256xf32>
      %313 = arith.addf %308, %312 : vector<8x256xf32>
      %c46 = arith.constant 46 : index
      %314 = arith.index_cast %2 : i32 to index
      %315 = vector.load %arg3[%c46, %314] : memref<64x512xf32, #tpu.memory_space<vmem>>, vector<1x256xf32>
      %316 = vector.broadcast %315 : vector<1x256xf32> to vector<8x256xf32>
      %317 = arith.mulf %79, %316 : vector<8x256xf32>
      %318 = arith.addf %313, %317 : vector<8x256xf32>
      %c47 = arith.constant 47 : index
      %319 = arith.index_cast %2 : i32 to index
      %320 = vector.load %arg3[%c47, %319] : memref<64x512xf32, #tpu.memory_space<vmem>>, vector<1x256xf32>
      %321 = vector.broadcast %320 : vector<1x256xf32> to vector<8x256xf32>
      %322 = arith.mulf %80, %321 : vector<8x256xf32>
      %323 = arith.addf %318, %322 : vector<8x256xf32>
      %324 = arith.mulf %66, %323 : vector<8x256xf32>
      %325 = arith.addf %284, %324 : vector<8x256xf32>
      %c48 = arith.constant 48 : index
      %326 = arith.index_cast %2 : i32 to index
      %327 = vector.load %arg3[%c48, %326] : memref<64x512xf32, #tpu.memory_space<vmem>>, vector<1x256xf32>
      %328 = vector.broadcast %327 : vector<1x256xf32> to vector<8x256xf32>
      %329 = arith.mulf %73, %328 : vector<8x256xf32>
      %c49 = arith.constant 49 : index
      %330 = arith.index_cast %2 : i32 to index
      %331 = vector.load %arg3[%c49, %330] : memref<64x512xf32, #tpu.memory_space<vmem>>, vector<1x256xf32>
      %332 = vector.broadcast %331 : vector<1x256xf32> to vector<8x256xf32>
      %333 = arith.mulf %74, %332 : vector<8x256xf32>
      %334 = arith.addf %329, %333 : vector<8x256xf32>
      %c50 = arith.constant 50 : index
      %335 = arith.index_cast %2 : i32 to index
      %336 = vector.load %arg3[%c50, %335] : memref<64x512xf32, #tpu.memory_space<vmem>>, vector<1x256xf32>
      %337 = vector.broadcast %336 : vector<1x256xf32> to vector<8x256xf32>
      %338 = arith.mulf %75, %337 : vector<8x256xf32>
      %339 = arith.addf %334, %338 : vector<8x256xf32>
      %c51 = arith.constant 51 : index
      %340 = arith.index_cast %2 : i32 to index
      %341 = vector.load %arg3[%c51, %340] : memref<64x512xf32, #tpu.memory_space<vmem>>, vector<1x256xf32>
      %342 = vector.broadcast %341 : vector<1x256xf32> to vector<8x256xf32>
      %343 = arith.mulf %76, %342 : vector<8x256xf32>
      %344 = arith.addf %339, %343 : vector<8x256xf32>
      %c52 = arith.constant 52 : index
      %345 = arith.index_cast %2 : i32 to index
      %346 = vector.load %arg3[%c52, %345] : memref<64x512xf32, #tpu.memory_space<vmem>>, vector<1x256xf32>
      %347 = vector.broadcast %346 : vector<1x256xf32> to vector<8x256xf32>
      %348 = arith.mulf %77, %347 : vector<8x256xf32>
      %349 = arith.addf %344, %348 : vector<8x256xf32>
      %c53 = arith.constant 53 : index
      %350 = arith.index_cast %2 : i32 to index
      %351 = vector.load %arg3[%c53, %350] : memref<64x512xf32, #tpu.memory_space<vmem>>, vector<1x256xf32>
      %352 = vector.broadcast %351 : vector<1x256xf32> to vector<8x256xf32>
      %353 = arith.mulf %78, %352 : vector<8x256xf32>
      %354 = arith.addf %349, %353 : vector<8x256xf32>
      %c54 = arith.constant 54 : index
      %355 = arith.index_cast %2 : i32 to index
      %356 = vector.load %arg3[%c54, %355] : memref<64x512xf32, #tpu.memory_space<vmem>>, vector<1x256xf32>
      %357 = vector.broadcast %356 : vector<1x256xf32> to vector<8x256xf32>
      %358 = arith.mulf %79, %357 : vector<8x256xf32>
      %359 = arith.addf %354, %358 : vector<8x256xf32>
      %c55 = arith.constant 55 : index
      %360 = arith.index_cast %2 : i32 to index
      %361 = vector.load %arg3[%c55, %360] : memref<64x512xf32, #tpu.memory_space<vmem>>, vector<1x256xf32>
      %362 = vector.broadcast %361 : vector<1x256xf32> to vector<8x256xf32>
      %363 = arith.mulf %80, %362 : vector<8x256xf32>
      %364 = arith.addf %359, %363 : vector<8x256xf32>
      %365 = arith.mulf %67, %364 : vector<8x256xf32>
      %366 = arith.addf %325, %365 : vector<8x256xf32>
      %c56 = arith.constant 56 : index
      %367 = arith.index_cast %2 : i32 to index
      %368 = vector.load %arg3[%c56, %367] : memref<64x512xf32, #tpu.memory_space<vmem>>, vector<1x256xf32>
      %369 = vector.broadcast %368 : vector<1x256xf32> to vector<8x256xf32>
      %370 = arith.mulf %73, %369 : vector<8x256xf32>
      %c57 = arith.constant 57 : index
      %371 = arith.index_cast %2 : i32 to index
      %372 = vector.load %arg3[%c57, %371] : memref<64x512xf32, #tpu.memory_space<vmem>>, vector<1x256xf32>
      %373 = vector.broadcast %372 : vector<1x256xf32> to vector<8x256xf32>
      %374 = arith.mulf %74, %373 : vector<8x256xf32>
      %375 = arith.addf %370, %374 : vector<8x256xf32>
      %c58 = arith.constant 58 : index
      %376 = arith.index_cast %2 : i32 to index
      %377 = vector.load %arg3[%c58, %376] : memref<64x512xf32, #tpu.memory_space<vmem>>, vector<1x256xf32>
      %378 = vector.broadcast %377 : vector<1x256xf32> to vector<8x256xf32>
      %379 = arith.mulf %75, %378 : vector<8x256xf32>
      %380 = arith.addf %375, %379 : vector<8x256xf32>
      %c59 = arith.constant 59 : index
      %381 = arith.index_cast %2 : i32 to index
      %382 = vector.load %arg3[%c59, %381] : memref<64x512xf32, #tpu.memory_space<vmem>>, vector<1x256xf32>
      %383 = vector.broadcast %382 : vector<1x256xf32> to vector<8x256xf32>
      %384 = arith.mulf %76, %383 : vector<8x256xf32>
      %385 = arith.addf %380, %384 : vector<8x256xf32>
      %c60 = arith.constant 60 : index
      %386 = arith.index_cast %2 : i32 to index
      %387 = vector.load %arg3[%c60, %386] : memref<64x512xf32, #tpu.memory_space<vmem>>, vector<1x256xf32>
      %388 = vector.broadcast %387 : vector<1x256xf32> to vector<8x256xf32>
      %389 = arith.mulf %77, %388 : vector<8x256xf32>
      %390 = arith.addf %385, %389 : vector<8x256xf32>
      %c61 = arith.constant 61 : index
      %391 = arith.index_cast %2 : i32 to index
      %392 = vector.load %arg3[%c61, %391] : memref<64x512xf32, #tpu.memory_space<vmem>>, vector<1x256xf32>
      %393 = vector.broadcast %392 : vector<1x256xf32> to vector<8x256xf32>
      %394 = arith.mulf %78, %393 : vector<8x256xf32>
      %395 = arith.addf %390, %394 : vector<8x256xf32>
      %c62 = arith.constant 62 : index
      %396 = arith.index_cast %2 : i32 to index
      %397 = vector.load %arg3[%c62, %396] : memref<64x512xf32, #tpu.memory_space<vmem>>, vector<1x256xf32>
      %398 = vector.broadcast %397 : vector<1x256xf32> to vector<8x256xf32>
      %399 = arith.mulf %79, %398 : vector<8x256xf32>
      %400 = arith.addf %395, %399 : vector<8x256xf32>
      %c63 = arith.constant 63 : index
      %401 = arith.index_cast %2 : i32 to index
      %402 = vector.load %arg3[%c63, %401] : memref<64x512xf32, #tpu.memory_space<vmem>>, vector<1x256xf32>
      %403 = vector.broadcast %402 : vector<1x256xf32> to vector<8x256xf32>
      %404 = arith.mulf %80, %403 : vector<8x256xf32>
      %405 = arith.addf %400, %404 : vector<8x256xf32>
      %406 = arith.mulf %68, %405 : vector<8x256xf32>
      %407 = arith.addf %366, %406 : vector<8x256xf32>
      %c0_30 = arith.constant 0 : index
      %408 = arith.index_cast %2 : i32 to index
      %409 = vector.load %arg4[%c0_30, %408] : memref<8x512xf32, #tpu.memory_space<vmem>>, vector<8x256xf32>
      tpu.vector_store %arg4[%c0_30, %408], %407 {strides = array<i32>} : memref<8x512xf32, #tpu.memory_space<vmem>>, vector<8x256xf32>,
    }
    %c2_i32_0 = arith.constant 2 : i32
    return
  }
  func.func @transform_0(%arg0: i32, %arg1: i32) -> (i32, i32, i32) {
    %c0_i32 = arith.constant 0 : i32
    %c0_i32_0 = arith.constant 0 : i32
    return %c0_i32, %arg1, %arg0 : i32, i32, i32
  }
  func.func @transform_1(%arg0: i32, %arg1: i32) -> (i32, i32) {
    %c0_i32 = arith.constant 0 : i32
    %c0_i32_0 = arith.constant 0 : i32
    return %c0_i32, %arg0 : i32, i32
  }
  func.func @transform_2(%arg0: i32, %arg1: i32) -> (i32, i32) {
    %c0_i32 = arith.constant 0 : i32
    return %arg1, %arg0 : i32, i32
  }
}

</mosaic_0001>

<bundles_post_ra>
// kernel: tpu_custom_call.1
= control target key start
LH: loop header
LB: loop body
LE: loop exit
PB: predicated region body
PF: predicated region fallthrough
CT: control target
= control target key end

     0   :  { %7 = vsyncpa [#allocation3], 0  ;;  %s2656_s0 = inlined_call_operand.hbm [shape: f32[6,8,1024], index: 0, kind: input, shape index: {}]   ;;  %s2657_s1 = inlined_call_operand.hbm [shape: f32[64,1024], index: 1, kind: input, shape index: {}]   ;;  %s2658_s2 = inlined_call_operand.hbm [shape: f32[8,1024], index: 2, kind: output, shape index: {}]  }
   0x1   :  { %9 = vsyncpa [#allocation3 + $0x1], 0 }
   0x2   :  { %10 = vsyncpa [#allocation6], 0 }
   0x3   :  { %12 = vsyncpa [#allocation6 + $0x1], 0 }
   0x4   :  { %13 = vsyncpa [#allocation4], 0 }
   0x5   :  { %15 = vsyncpa [#allocation4 + $0x1], 0  ;;  %s1961_s9 = smov 0   ;;  %s1963_s10 = smov 0  }
   0x6   :  { %s1965_s11 = smov 0   ;;  %s1967_s12 = smov 0  }
   0x7   :  { %s1969_s13 = smov 0   ;;  %s1971_s14 = smov 0  }
   0x8 LB: > { %s1602_s15 = sadd.s32 4294967295, %s1934_s14   ;;  %s1603_s16 = sadd.s32 4294967294, %s1934_s14   ;;  %s1934_s14 = sphi %s1971_s14, %s21_s14   ;;  %s1930_s13 = sphi %s1969_s13, %s2675_s13   ;;  %s1926_s12 = sphi %s1967_s12, %s2674_s12   ;;  %s1922_s11 = sphi %s1965_s11, %s2673_s11   ;;  %s1918_s10 = sphi %s1963_s10, %s2672_s10   ;;  %s1914_s9 = sphi %s1961_s9, %s2671_s9  }
   0x9   : > { %s33_s17 = sadd.s32 1, %s1930_s13  ;;  %s42_s18 = sadd.s32 1, %s1922_s11 }
   0xa   : > { %p35_p0 = scmp.ge.s32.totalorder %s33_s17, 2  ;;  %p49_p1 = scmp.ne.s32.totalorder %s1922_s11, %s1918_s10 }
   0xb   : > { %p50_p2 = scmp.eq.s32.totalorder %s1934_s14, 0  ;;  %p55_p3 = scmp.ne.s32.totalorder %s1918_s10, %s1914_s9 }
   0xc   : > { %s2677_s17 = smov (%p35_p0, %s33_s17), 0  ;;  %p56_p5 = scmp.eq.s32.totalorder %s1602_s15, 0 }
   0xd   : > { %p2002_p4 = por %p50_p2, %p49_p1  ;;  %s38_s20 = ssub.s32 %s1930_s13, %s2677_s17 }
   0xe   : > { %p107_p6 = scmp.eq.s32.totalorder %s1602_s15, 1  ;;  %p40_p7 = scmp.eq.s32.totalorder %s38_s20, 0 }
   0xf   : > { %p2008_p8 = por %p56_p5, %p55_p3  ;;  %p113_p10 = scmp.eq.s32.totalorder %s1603_s16, 1 }
  0x10   : > { %p2012_p9 = por %p107_p6, %p49_p1  ;;  %p1723_p13 = scmp.lt.s32.totalorder %s1934_s14, 2 }
  0x11   : > { %s2662_s21 = scalar_select %p2008_p8, 1, 0 }
  0x12   : > { %s2663_s22 = scalar_select %p2012_p9, 1, 0 }
  0x13   : > { %s2017_s23 = scalar_select %p40_p7, %s1922_s11, %s42_s18  }
  0x14   : > { %p2019_p11 = por %p113_p10, %p55_p3  ;;  %s2026_s25 = sand.u32 1, %s1922_s11  }
  0x15   : > { %s1704_s26 = smul.u32 192, %s2026_s25  ;;  %s1701_s27 = sshll.u32 %s1930_s13, 9 }
  0x16   : > { %s2664_s24 = scalar_select %p2019_p11, 1, 0 }
  0x17   : > { %p2032_p0 = pnand %p1723_p13, %p2002_p4  ;;  %s2041_s3 = scalar_lea.hbm %s2656_s0, %s1701_s27 }
  0x18   : > { %s137_s4 = scalar_lea.vmem [#allocation2], %s1704_s26  ;;  %s134_s6 = scalar_lea.sflag [#allocation3], %s2026_s25 }
  0x19   : > { %s146_s5 = sshll.u32 %s137_s4, 4  ;;  %s1784_s7 = scalar_lea.hbm %s2041_s3, 3072  ;;  %s2043_s5 = int_to_ptr.vmem [resolvable:$true] %s146_s5 }
  0x1a   : > { %p1785_p1 = scmp.ne.s32.totalorder %s2041_s3, %s1784_s7  ;;  %p1786_p2 = pneg %p2032_p0 }
  0x1b   : > { %s1789_s16 = scalar_lea.hbm %s2656_s0, 6144  ;;  %p1790_p5 = scmp.lt.u32.totalorder %s2041_s3, %s2656_s0 }
  0x1c   : > { %p1787_p3 = pnand %p1786_p2, %p1785_p1  ;;  %p1791_p6 = scmp.lt.u32.totalorder %s1789_s16, %s1784_s7 }
  0x1d   : > { %p1793_p10 = scmp.lt.u32.totalorder %s1784_s7, %s2041_s3 }
  0x1e   : > { %p1788_p4 = pneg %p1787_p3  ;;  %p1792_p7 = por %p1791_p6, %p1790_p5 }
  0x20   : > { %p1794_p13 = por %p1793_p10, %p1792_p7 }
  0x22   : > { %p1795_p12 = pnand %p1794_p13, %p1788_p4 }
  0x24   : > { %1798 = shalt.err (!%p1795_p12)
}
  0x25   : > { %s1799_s20 = scalar_lea.vmem %s2043_s5, 3072  ;;  %s1940_s26 = smov [#allocation2]  }
  0x26   : > { %p1800_p1 = scmp.ne.s32.totalorder %s2043_s5, %s1799_s20  ;;  %s1804_s29 = sshll.u32 %s1940_s26, 4  ;;  %s1805_s29 = int_to_ptr.vmem [resolvable:$false] %s1804_s29 }
  0x27   : > { %s1806_s30 = scalar_lea.vmem %s1805_s29, 6144  ;;  %p1807_p9 = scmp.lt.s32.totalorder %s2043_s5, %s1805_s29 }
  0x28   : > { %p1802_p3 = pnand %p1800_p1, %p1786_p2  ;;  %p1808_p5 = scmp.lt.s32.totalorder %s1806_s30, %s1799_s20 }
  0x2a   : > { %p1803_p11 = pneg %p1802_p3  ;;  %p1809_p6 = por %p1808_p5, %p1807_p9 }
  0x2c   : > { %p1810_p7 = pnand %p1809_p6, %p1803_p11 }
  0x2e   : > { %1813 = shalt.err (!%p1810_p7)
}
  0x2f   : > { %s1941_s4 = smov 1024   ;;  %s1942_s7 = smov 512  }
  0x30   : > { %s1943_s8 = smov 32   ;;  %p1611_p9 = scmp.ge.s32.totalorder %s1934_s14, 1 }
  0x31   : > { %1715 = dma.hbm_to_vmem [thread:$0]  (!%p2032_p0), %s2041_s3, 3072, %s2043_s5, %s134_s6, %s1941_s4, %s1942_s7, %s1943_s8  }
  0x32   : > { %p175_p11 = scmp.lt.s32.totalorder %s1934_s14, 3  ;;  %s1608_s15 = sshll.u32 %s2026_s25, 8 }
  0x33   : > { %s2088_s20 = scalar_lea.hbm %s2657_s1, %s1701_s27  ;;  %s160_s26 = scalar_lea.vmem [#allocation5], %s1608_s15 }
  0x34   : > { %p2079_p12 = pnand %p1611_p9, %p175_p11  ;;  %s167_s29 = sshll.u32 %s160_s26, 4  ;;  %s2090_s29 = int_to_ptr.vmem [resolvable:$true] %s167_s29 }
  0x35   : > { %s157_s3 = scalar_lea.sflag [#allocation6], %s2026_s25  ;;  %s1814_s5 = scalar_lea.hbm %s2088_s20, 4096 }
  0x36   : > { %p1815_p4 = scmp.ne.s32.totalorder %s2088_s20, %s1814_s5  ;;  %s1819_s27 = scalar_lea.hbm %s2657_s1, 8192 }
  0x37   : > { %p1820_p1 = scmp.lt.u32.totalorder %s2088_s20, %s2657_s1  ;;  %p1821_p3 = scmp.lt.u32.totalorder %s1819_s27, %s1814_s5 }
  0x38   : > { %p1817_p10 = pnand %p1815_p4, %p1786_p2  ;;  %p1823_p6 = scmp.lt.u32.totalorder %s1814_s5, %s2088_s20 }
  0x39   : > { %p1822_p5 = por %p1821_p3, %p1820_p1 }
  0x3a   : > { %p1818_p13 = pneg %p1817_p10 }
  0x3b   : > { %p1824_p7 = por %p1823_p6, %p1822_p5 }
  0x3d   : > { %p1825_p9 = pnand %p1824_p7, %p1818_p13 }
  0x3f   : > { %1828 = shalt.err (!%p1825_p9)
}
  0x40   : > { %s1829_s15 = scalar_lea.vmem %s2090_s29, 4096  ;;  %s1944_s26 = smov [#allocation5]  }
  0x41   : > { %p1830_p11 = scmp.ne.s32.totalorder %s2090_s29, %s1829_s15  ;;  %s1834_s6 = sshll.u32 %s1944_s26, 4  ;;  %s1835_s6 = int_to_ptr.vmem [resolvable:$false] %s1834_s6 }
  0x42   : > { %s1836_s30 = scalar_lea.vmem %s1835_s6, 8192  ;;  %p1837_p8 = scmp.lt.s32.totalorder %s2090_s29, %s1835_s6 }
  0x43   : > { %p1832_p4 = pnand %p1830_p11, %p1786_p2  ;;  %p1838_p1 = scmp.lt.s32.totalorder %s1836_s30, %s1829_s15 }
  0x45   : > { %p1833_p10 = pneg %p1832_p4  ;;  %p1839_p3 = por %p1838_p1, %p1837_p8 }
  0x47   : > { %p1840_p5 = pnand %p1839_p3, %p1833_p10 }
  0x49   : > { %1843 = shalt.err (!%p1840_p5)
}
  0x4a   : > { %1718 = dma.hbm_to_vmem [thread:$0]  (!%p2032_p0), %s2088_s20, 4096, %s2090_s29, %s157_s3, %s1941_s4, %s1942_s7, %s1943_s8  }
  0x4b   : > { %179 = sbr.rel (%p2079_p12) target bundleno = 234 (0xea), region = 28  ;;  %s2124_s5 = sand.u32 (!%p2079_p12), 1, %s1918_s10  }
  0x4c   : > { %s1705_s27 = smul.u32 (!%p2079_p12), 192, %s2124_s5  ;;  %s182_s18 = scalar_lea.sflag (!%p2079_p12), [#allocation3], %s2124_s5 }
  0x4d   : > { %p2667_p8 = scmp.ne.s32.totalorder (!%p2079_p12), %s2662_s21, 0 }
  0x4e   : > { %s2128_s28 = scalar_lea.vmem (!%p2079_p12), [#allocation2], %s1705_s27 }
  0x52   : > { %1901 = dma.done.wait (%p2667_p8), %s182_s18, 3072  }
  0x53   : > { %1903 = vsyncadd (%p2667_p8), %s182_s18, 4294964224  ;;  %s1612_s25 = sshll.u32 %s2124_s5, 8  ;;  %s191_s4 = scalar_lea.sflag [#allocation6], %s2124_s5 }
  0x54   : > { %s2136_s7 = scalar_lea.vmem [#allocation5], %s1612_s25 }
  0x55   : > { %1905 = dma.done.wait (%p2667_p8), %s191_s4, 4096  }
  0x56   : > { %1907 = vsyncadd (%p2667_p8), %s191_s4, 4294963200  ;;  %s1613_s8 = sshll.u32 %s2124_s5, 5  ;;  %s2145_s20 = smov 0  }
  0x57   : > { %s2143_s16 = scalar_lea.vmem [#allocation7], %s1613_s8 }
  0x58 LB: >> { %v349_v0 = vlaneseq  ;;  %s1614_s29 = sshll.u32 %s1938_s20, 8  ;;  %s228_s20 = sadd.s32 1, %s1938_s20   ;;  %s1938_s20 = sphi %s2145_s20, %s228_s20  }
  0x59   : >> { %s230_s3 = sshra.s32 %s1614_s29, 7  ;;  %p225_p0 = scmp.ge.s32.totalorder %s228_s20, 2  }
  0x5a   : >> { %s2151_s19 = sshll.u32 %s230_s3, 3  ;;  %v350_v1 = vshrl.u32 %v349_v0, 7  ;;  %s1703_s6 = sshll.u32 (%p225_p0), %s1926_s12, 9 }
  0x5b   : >> { %s233_s21 = scalar_lea.vmem %s2128_s28, %s2151_s19 [#allocation2]  ;;  %s2201_s15 = scalar_lea.vmem %s2136_s7, %s2151_s19 [#allocation5] }
  0x5c   : >> { %v234_v2 = vld [vmem:[%s233_s21] sm:$0xff]  ;;  %v235_v3 = vld [vmem:[%s233_s21 + $0x8] sm:$0xff]  ;;  %v2155_v10 = vsub.s32 0, %v350_v1  ;;  %v2157_v11 = vsub.s32 1, %v350_v1  ;;  %s1449_s26 = scalar_lea.vmem %s2143_s16, %s2151_s19 [#allocation7]  ;;  %s2612_s18 = scalar_lea.hbm (%p225_p0), %s2658_s2, %s1703_s6 }
  0x5d   : >> { %v1617_v4 = vld [vmem:[%s233_s21 + $0x20] sm:$0xff]  ;;  %v238_v5 = vsub.f32 1.0, %v234_v2  ;;  %v239_v6 = vsub.f32 1.0, %v235_v3  ;;  %v1618_v7 = vld [vmem:[%s233_s21 + $0x28] sm:$0xff]  ;;  %v236_v12 = vmax.f32 %v234_v2, 0.0  ;;  %v237_v13 = vmax.f32 %v235_v3, 0.0 }
  0x5e   : >> { %v1620_v8 = vld [vmem:[%s233_s21 + $0x40] sm:$0xff]  ;;  %v1621_v9 = vld [vmem:[%s233_s21 + $0x48] sm:$0xff]  ;;  %v249_v14 = vsub.f32 1.0, %v1617_v4  ;;  %v250_v15 = vsub.f32 1.0, %v1618_v7  ;;  %v247_v17 = vmax.f32 %v1617_v4, 0.0  ;;  %v248_v18 = vmax.f32 %v1618_v7, 0.0 }
  0x5f   : >> { %v240_v16 = vmax.f32 %v238_v5, 0.0  ;;  %v1623_v19 = vld [vmem:[%s233_s21 + $0x60] sm:$0xff]  ;;  %v1624_v20 = vld [vmem:[%s233_s21 + $0x68] sm:$0xff]  ;;  %v241_v22 = vmax.f32 %v239_v6, 0.0  ;;  %v260_v23 = vsub.f32 1.0, %v1620_v8  ;;  %v261_v24 = vsub.f32 1.0, %v1621_v9 }
  0x60   : >> { %v1626_v21 = vld [vmem:[%s233_s21 + $0x80] sm:$0xff]  ;;  %v1627_v25 = vld [vmem:[%s233_s21 + $0x88] sm:$0xff]  ;;  %v2159_v28 = vmax.f32 %v1620_v8, 0.0  ;;  %v2161_v29 = vmax.f32 %v1621_v9, 0.0  ;;  %v271_v30 = vsub.f32 1.0, %v1623_v19  ;;  %v272_v31 = vsub.f32 1.0, %v1624_v20 }
  0x61   : >> { %v1629_v26 = vld [vmem:[%s233_s21 + $0xa0] sm:$0xff]  ;;  %v1630_v27 = vld [vmem:[%s233_s21 + $0xa8] sm:$0xff]  ;;  %v251_v32 = vmax.f32 %v249_v14, 0.0  ;;  %v252_v33 = vmax.f32 %v250_v15, 0.0  ;;  %v269_v34 = vmax.f32 %v1623_v19, 0.0  ;;  %v270_v35 = vmax.f32 %v1624_v20, 0.0 }
  0x62   : >> { %v282_v36 = vsub.f32 1.0, %v1626_v21  ;;  %v283_v37 = vsub.f32 1.0, %v1627_v25  ;;  %v293_v38 = vsub.f32 1.0, %v1629_v26  ;;  %v294_v39 = vsub.f32 1.0, %v1630_v27  ;;  %s1469_s25 = sshll.u32 (%p225_p0), %s2143_s16, 4  ;;  %s1453_s4 = scalar_lea.sflag (%p225_p0), [#allocation4], %s2124_s5  ;;  %s1470_s25 = int_to_ptr.vmem [resolvable:$true] %s1469_s25 }
  0x63   : >> { %v2163_v40 = vmax.f32 %v260_v23, 0.0  ;;  %v2165_v41 = vmax.f32 %v261_v24, 0.0  ;;  %v280_v42 = vmax.f32 %v1626_v21, 0.0  ;;  %v281_v43 = vmax.f32 %v1627_v25, 0.0  ;;  %s1844_s8 = scalar_lea.vmem (%p225_p0), %s1470_s25, 512  ;;  %p2668_p12 = scmp.ne.s32.totalorder (%p225_p0), %s2663_s22, 0 }
  0x64   : >> { %v273_v44 = vmax.f32 %v271_v30, 0.0  ;;  %v274_v45 = vmax.f32 %v272_v31, 0.0  ;;  %v297_v46 = vmul.f32 %v247_v17, %v236_v12  ;;  %v298_v47 = vmul.f32 %v248_v18, %v237_v13  ;;  %v1632_v23 = vld [vmem:[%s2201_s15 + $0x1] ss:$8 sm:$0x3]  ;;  %p1845_p2 = scmp.ne.s32.totalorder (%p225_p0), %s1470_s25, %s1844_s8  ;;  %s1945_s20 = smov (%p225_p0), [#allocation7]  }
  0x65   : >> { %v291_v48 = vmax.f32 %v1629_v26, 0.0  ;;  %v292_v49 = vmax.f32 %v1630_v27, 0.0  ;;  %v299_v50 = vmul.f32 %v251_v32, %v236_v12  ;;  %v300_v51 = vmul.f32 %v252_v33, %v237_v13  ;;  %v1633_v30 = vld [vmem:[%s2201_s15 + $0x2] ss:$8 sm:$0x3]  ;;  %s1848_s29 = sshll.u32 (%p225_p0), %s1945_s20, 4  ;;  %s1849_s29 = int_to_ptr.vmem [resolvable:$false] %s1848_s29 }
  0x66   : >> { %v284_v52 = vmax.f32 %v282_v36, 0.0  ;;  %v285_v53 = vmax.f32 %v283_v37, 0.0  ;;  %v295_v54 = vmax.f32 %v293_v38, 0.0  ;;  %v296_v55 = vmax.f32 %v294_v39, 0.0  ;;  %p1846_p13 = pnand (%p225_p0), %p1845_p2, %p2668_p12  ;;  %s1850_s28 = scalar_lea.vmem (%p225_p0), %s1849_s29, 1024 }
  0x67   : >> { %v2167_v56 = vmul.f32 %v247_v17, %v240_v16  ;;  %v2169_v57 = vmul.f32 %v248_v18, %v241_v22  ;;  %v2171_v58 = vmul.f32 %v251_v32, %v240_v16  ;;  %v2173_v59 = vmul.f32 %v252_v33, %v241_v22  ;;  %v347_v22 = vld [vmem:[%s2201_s15] ss:$8 sm:$0x3]  ;;  %v1634_v31 = vld [vmem:[%s2201_s15 + $0x3] ss:$8 sm:$0x3]  ;;  %p1851_p7 = scmp.lt.s32.totalorder (%p225_p0), %s1470_s25, %s1849_s29  ;;  %p1852_p9 = scmp.lt.s32.totalorder (%p225_p0), %s1850_s28, %s1844_s8 }
  0x68   : >> { %v2176_v60 = vmul.f32 %v297_v46, %v2159_v28  ;;  %v2179_v61 = vmul.f32 %v298_v47, %v2161_v29  ;;  %v2182_v62 = vmul.f32 %v297_v46, %v2163_v40  ;;  %v2185_v63 = vmul.f32 %v298_v47, %v2165_v41  ;;  %v1635_v46 = vld [vmem:[%s2201_s15 + $0x4] ss:$8 sm:$0x3]  ;;  %p1847_p6 = pneg (%p225_p0), %p1846_p13 }
  0x69   : >> { %v2188_v0 = vmul.f32 %v299_v50, %v2159_v28  ;;  %v2191_v1 = vmul.f32 %v300_v51, %v2161_v29  ;;  %v2194_v2 = vmul.f32 %v299_v50, %v2163_v40  ;;  %v2197_v3 = vmul.f32 %v300_v51, %v2165_v41  ;;  %v1636_v51 = vld [vmem:[%s2201_s15 + $0x5] ss:$8 sm:$0x3]  ;;  %p1853_p11 = por (%p225_p0), %p1852_p9, %p1851_p7 }
  0x6a   : >> { %v321_v4 = vmul.f32 %v280_v42, %v269_v34  ;;  %v322_v5 = vmul.f32 %v281_v43, %v270_v35  ;;  %v323_v6 = vmul.f32 %v284_v52, %v269_v34  ;;  %v324_v7 = vmul.f32 %v285_v53, %v270_v35 }
  0x6b   : >> { %v325_v8 = vmul.f32 %v280_v42, %v273_v44  ;;  %v326_v9 = vmul.f32 %v281_v43, %v274_v45  ;;  %v327_v12 = vmul.f32 %v284_v52, %v273_v44  ;;  %v328_v13 = vmul.f32 %v285_v53, %v274_v45  ;;  %v1637_v52 = vld [vmem:[%s2201_s15 + $0x6] ss:$8 sm:$0x3]  ;;  %p1854_p4 = pnand (%p225_p0), %p1853_p11, %p1847_p6 }
  0x6c   : >> { %v2203_v14 = vmul.f32 %v321_v4, %v291_v48  ;;  %v2205_v15 = vmul.f32 %v322_v5, %v292_v49  ;;  %v2207_v16 = vmul.f32 %v321_v4, %v295_v54  ;;  %v2209_v17 = vmul.f32 %v322_v5, %v296_v55 }
  0x6d   : >> { %v2211_v18 = vmul.f32 %v323_v6, %v291_v48  ;;  %v2213_v19 = vmul.f32 %v324_v7, %v292_v49  ;;  %v2215_v20 = vmul.f32 %v323_v6, %v295_v54  ;;  %v2217_v21 = vmul.f32 %v324_v7, %v296_v55 }
  0x6e   : >> { %v2221_v24 = vmul.f32 %v325_v8, %v291_v48  ;;  %v2223_v25 = vmul.f32 %v326_v9, %v292_v49  ;;  %v2225_v26 = vmul.f32 %v325_v8, %v295_v54  ;;  %v2227_v27 = vmul.f32 %v326_v9, %v296_v55 }
  0x6f   : >> { %v2231_v32 = vmul.f32 %v327_v12, %v291_v48  ;;  %v2233_v33 = vmul.f32 %v328_v13, %v292_v49  ;;  %v2235_v34 = vmul.f32 %v327_v12, %v295_v54  ;;  %v2237_v35 = vmul.f32 %v328_v13, %v296_v55 }
  0x70   : >> { %v352_v36 = vrot.slane %v347_v22, %v2155_v10  ;;  %v356_v37 = vrot.slane %v347_v22, %v2157_v11  ;;  %v367_v38 = vrot.slane %v1632_v23, %v2155_v10  ;;  %v371_v39 = vrot.slane %v1632_v23, %v2157_v11  ;;  %v1638_v23 = vld [vmem:[%s2201_s15 + $0x7] ss:$8 sm:$0x3] }
  0x71   : >> { %v384_v42 = vrot.slane %v1633_v30, %v2155_v10  ;;  %v388_v43 = vrot.slane %v1633_v30, %v2157_v11  ;;  %v401_v44 = vrot.slane %v1634_v31, %v2155_v10  ;;  %v405_v45 = vrot.slane %v1634_v31, %v2157_v11 }
  0x72   : >> { %v359_v47 = vmul.f32 %v352_v36, %v2203_v14  ;;  %v360_v48 = vmul.f32 %v356_v37, %v2205_v15  ;;  %v374_v49 = vmul.f32 %v367_v38, %v2207_v16  ;;  %v375_v50 = vmul.f32 %v371_v39, %v2209_v17  ;;  %v1639_v38 = vld [vmem:[%s2201_s15 + $0x20] ss:$8 sm:$0x3]  ;;  %v1640_v39 = vld [vmem:[%s2201_s15 + $0x21] ss:$8 sm:$0x3] }
  0x73   : >> { %v391_v53 = vmul.f32 %v384_v42, %v2211_v18  ;;  %v392_v54 = vmul.f32 %v388_v43, %v2213_v19  ;;  %v408_v55 = vmul.f32 %v401_v44, %v2215_v20  ;;  %v409_v4 = vmul.f32 %v405_v45, %v2217_v21 }
  0x74   : >> { %v376_v5 = vadd.f32 %v374_v49, %v359_v47  ;;  %v377_v6 = vadd.f32 %v375_v50, %v360_v48  ;;  %v418_v7 = vrot.slane %v1635_v46, %v2155_v10  ;;  %v422_v8 = vrot.slane %v1635_v46, %v2157_v11 }
  0x75   : >> { %v435_v9 = vrot.slane %v1636_v51, %v2155_v10  ;;  %v439_v12 = vrot.slane %v1636_v51, %v2157_v11  ;;  %v452_v13 = vrot.slane %v1637_v52, %v2155_v10  ;;  %v456_v22 = vrot.slane %v1637_v52, %v2157_v11 }
  0x76   : >> { %v393_v30 = vadd.f32 %v391_v53, %v376_v5  ;;  %v394_v31 = vadd.f32 %v392_v54, %v377_v6  ;;  %v425_v36 = vmul.f32 %v418_v7, %v2221_v24  ;;  %v426_v37 = vmul.f32 %v422_v8, %v2223_v25  ;;  %v1641_v54 = vld [vmem:[%s2201_s15 + $0x22] ss:$8 sm:$0x3] }
  0x77   : >> { %v442_v42 = vmul.f32 %v435_v9, %v2225_v26  ;;  %v443_v43 = vmul.f32 %v439_v12, %v2227_v27  ;;  %v459_v44 = vmul.f32 %v452_v13, %v2231_v32  ;;  %v460_v45 = vmul.f32 %v456_v22, %v2233_v33 }
  0x78   : >> { %v410_v46 = vadd.f32 %v408_v55, %v393_v30  ;;  %v411_v47 = vadd.f32 %v409_v4, %v394_v31  ;;  %v469_v48 = vrot.slane %v1638_v23, %v2155_v10  ;;  %v473_v49 = vrot.slane %v1638_v23, %v2157_v11  ;;  %v1642_v4 = vld [vmem:[%s2201_s15 + $0x23] ss:$8 sm:$0x3] }
  0x79   : >> { %v488_v50 = vrot.slane %v1639_v38, %v2155_v10  ;;  %v492_v51 = vrot.slane %v1639_v38, %v2157_v11  ;;  %v503_v52 = vrot.slane %v1640_v39, %v2155_v10  ;;  %v507_v53 = vrot.slane %v1640_v39, %v2157_v11 }
  0x7a   : >> { %v427_v5 = vadd.f32 %v425_v36, %v410_v46  ;;  %v428_v6 = vadd.f32 %v426_v37, %v411_v47  ;;  %v476_v7 = vmul.f32 %v469_v48, %v2235_v34  ;;  %v477_v55 = vmul.f32 %v473_v49, %v2237_v35  ;;  %v1643_v36 = vld [vmem:[%s2201_s15 + $0x24] ss:$8 sm:$0x3] }
  0x7b   : >> { %v495_v8 = vmul.f32 %v488_v50, %v2203_v14  ;;  %v496_v9 = vmul.f32 %v492_v51, %v2205_v15  ;;  %v510_v12 = vmul.f32 %v503_v52, %v2207_v16  ;;  %v511_v13 = vmul.f32 %v507_v53, %v2209_v17 }
  0x7c   : >> { %v444_v22 = vadd.f32 %v442_v42, %v427_v5  ;;  %v445_v23 = vadd.f32 %v443_v43, %v428_v6  ;;  %v520_v30 = vrot.slane %v1641_v54, %v2155_v10  ;;  %v524_v31 = vrot.slane %v1641_v54, %v2157_v11  ;;  %v1644_v43 = vld [vmem:[%s2201_s15 + $0x25] ss:$8 sm:$0x3]  ;;  %v1645_v6 = vld [vmem:[%s2201_s15 + $0x26] ss:$8 sm:$0x3] }
  0x7d   : >> { %v512_v37 = vadd.f32 %v510_v12, %v495_v8  ;;  %v513_v38 = vadd.f32 %v511_v13, %v496_v9  ;;  %v537_v39 = vrot.slane %v1642_v4, %v2155_v10  ;;  %v541_v46 = vrot.slane %v1642_v4, %v2157_v11  ;;  %v1646_v13 = vld [vmem:[%s2201_s15 + $0x27] ss:$8 sm:$0x3] }
  0x7e   : >> { %v461_v47 = vadd.f32 %v459_v44, %v444_v22  ;;  %v462_v48 = vadd.f32 %v460_v45, %v445_v23  ;;  %v527_v49 = vmul.f32 %v520_v30, %v2211_v18  ;;  %v528_v42 = vmul.f32 %v524_v31, %v2213_v19 }
  0x7f   : >> { %v544_v50 = vmul.f32 %v537_v39, %v2215_v20  ;;  %v545_v51 = vmul.f32 %v541_v46, %v2217_v21  ;;  %v554_v52 = vrot.slane %v1643_v36, %v2155_v10  ;;  %v558_v53 = vrot.slane %v1643_v36, %v2157_v11  ;;  %v1647_v36 = vld [vmem:[%s2201_s15 + $0x40] ss:$8 sm:$0x3] }
  0x80   : >> { %v2301_v54 = vmul.f32 %v2167_v56, %v2159_v28  ;;  %v2305_v44 = vmul.f32 %v2169_v57, %v2161_v29  ;;  %v529_v45 = vadd.f32 %v527_v49, %v512_v37  ;;  %v530_v5 = vadd.f32 %v528_v42, %v513_v38 }
  0x81   : >> { %v561_v4 = vmul.f32 %v554_v52, %v2221_v24  ;;  %v562_v8 = vmul.f32 %v558_v53, %v2223_v25  ;;  %v571_v9 = vrot.slane %v1644_v43, %v2155_v10  ;;  %v575_v12 = vrot.slane %v1644_v43, %v2157_v11  ;;  %v1649_v52 = vld [vmem:[%s2201_s15 + $0x42] ss:$8 sm:$0x3] }
  0x82   : >> { %v478_v22 = vadd.f32 %v476_v7, %v461_v47  ;;  %v479_v23 = vadd.f32 %v477_v55, %v462_v48  ;;  %v546_v30 = vadd.f32 %v544_v50, %v529_v45  ;;  %v547_v31 = vadd.f32 %v545_v51, %v530_v5  ;;  %v1648_v55 = vld [vmem:[%s2201_s15 + $0x41] ss:$8 sm:$0x3] }
  0x83   : >> { %v578_v37 = vmul.f32 %v571_v9, %v2225_v26  ;;  %v579_v38 = vmul.f32 %v575_v12, %v2227_v27  ;;  %v588_v39 = vrot.slane %v1645_v6, %v2155_v10  ;;  %v592_v46 = vrot.slane %v1645_v6, %v2157_v11 }
  0x84   : >> { %v563_v49 = vadd.f32 %v561_v4, %v546_v30  ;;  %v564_v42 = vadd.f32 %v562_v8, %v547_v31  ;;  %v605_v43 = vrot.slane %v1646_v13, %v2155_v10  ;;  %v609_v7 = vrot.slane %v1646_v13, %v2157_v11  ;;  %v1650_v4 = vld [vmem:[%s2201_s15 + $0x43] ss:$8 sm:$0x3] }
  0x85   : >> { %v595_v47 = vmul.f32 %v588_v39, %v2231_v32  ;;  %v596_v48 = vmul.f32 %v592_v46, %v2233_v33  ;;  %v626_v50 = vrot.slane %v1647_v36, %v2155_v10  ;;  %v630_v51 = vrot.slane %v1647_v36, %v2157_v11 }
  0x86   : >> { %v580_v53 = vadd.f32 %v578_v37, %v563_v49  ;;  %v581_v45 = vadd.f32 %v579_v38, %v564_v42  ;;  %v612_v5 = vmul.f32 %v605_v43, %v2235_v34  ;;  %v613_v6 = vmul.f32 %v609_v7, %v2237_v35  ;;  %v1651_v42 = vld [vmem:[%s2201_s15 + $0x44] ss:$8 sm:$0x3] }
  0x87   : >> { %v633_v8 = vmul.f32 %v626_v50, %v2203_v14  ;;  %v634_v9 = vmul.f32 %v630_v51, %v2205_v15  ;;  %v641_v12 = vrot.slane %v1648_v55, %v2155_v10  ;;  %v645_v13 = vrot.slane %v1648_v55, %v2157_v11 }
  0x88   : >> { %v597_v30 = vadd.f32 %v595_v47, %v580_v53  ;;  %v598_v31 = vadd.f32 %v596_v48, %v581_v45  ;;  %v658_v36 = vrot.slane %v1649_v52, %v2155_v10  ;;  %v662_v37 = vrot.slane %v1649_v52, %v2157_v11  ;;  %v1652_v48 = vld [vmem:[%s2201_s15 + $0x45] ss:$8 sm:$0x3] }
  0x89   : >> { %v648_v38 = vmul.f32 %v641_v12, %v2207_v16  ;;  %v649_v39 = vmul.f32 %v645_v13, %v2209_v17  ;;  %v675_v46 = vrot.slane %v1650_v4, %v2155_v10  ;;  %v679_v49 = vrot.slane %v1650_v4, %v2157_v11 }
  0x8a   : >> { %v614_v43 = vadd.f32 %v612_v5, %v597_v30  ;;  %v615_v7 = vadd.f32 %v613_v6, %v598_v31  ;;  %v665_v55 = vmul.f32 %v658_v36, %v2211_v18  ;;  %v666_v47 = vmul.f32 %v662_v37, %v2213_v19  ;;  %v1654_v31 = vld [vmem:[%s2201_s15 + $0x47] ss:$8 sm:$0x3] }
  0x8b   : >> { %v650_v50 = vadd.f32 %v648_v38, %v633_v8  ;;  %v651_v51 = vadd.f32 %v649_v39, %v634_v9  ;;  %v682_v52 = vmul.f32 %v675_v46, %v2215_v20  ;;  %v683_v53 = vmul.f32 %v679_v49, %v2217_v21  ;;  %v1653_v9 = vld [vmem:[%s2201_s15 + $0x46] ss:$8 sm:$0x3] }
  0x8c   : >> { %v480_v45 = vmul.f32 %v478_v22, %v2176_v60  ;;  %v481_v4 = vmul.f32 %v479_v23, %v2179_v61  ;;  %v692_v5 = vrot.slane %v1651_v42, %v2155_v10  ;;  %v696_v6 = vrot.slane %v1651_v42, %v2157_v11  ;;  %v1655_v22 = vld [vmem:[%s2201_s15 + $0x60] ss:$8 sm:$0x3] }
  0x8d   : >> { %v667_v12 = vadd.f32 %v665_v55, %v650_v50  ;;  %v668_v13 = vadd.f32 %v666_v47, %v651_v51  ;;  %v709_v30 = vrot.slane %v1652_v48, %v2155_v10  ;;  %v713_v8 = vrot.slane %v1652_v48, %v2157_v11  ;;  %v1656_v48 = vld [vmem:[%s2201_s15 + $0x61] ss:$8 sm:$0x3]  ;;  %v1657_v50 = vld [vmem:[%s2201_s15 + $0x62] ss:$8 sm:$0x3] }
  0x8e   : >> { %v616_v36 = vmul.f32 %v614_v43, %v2182_v62  ;;  %v617_v37 = vmul.f32 %v615_v7, %v2185_v63  ;;  %v699_v60 = vmul.f32 %v692_v5, %v2221_v24  ;;  %v700_v61 = vmul.f32 %v696_v6, %v2223_v25  ;;  %v1658_v6 = vld [vmem:[%s2201_s15 + $0x63] ss:$8 sm:$0x3] }
  0x8f   : >> { %v684_v23 = vadd.f32 %v682_v52, %v667_v12  ;;  %v685_v38 = vadd.f32 %v683_v53, %v668_v13  ;;  %v716_v39 = vmul.f32 %v709_v30, %v2225_v26  ;;  %v717_v46 = vmul.f32 %v713_v8, %v2227_v27 }
  0x90   : >> { %v726_v49 = vrot.slane %v1653_v9, %v2155_v10  ;;  %v730_v62 = vrot.slane %v1653_v9, %v2157_v11  ;;  %v743_v63 = vrot.slane %v1654_v31, %v2155_v10  ;;  %v747_v42 = vrot.slane %v1654_v31, %v2157_v11 }
  0x91   : >> { %v701_v43 = vadd.f32 %v699_v60, %v684_v23  ;;  %v702_v7 = vadd.f32 %v700_v61, %v685_v38  ;;  %v764_v55 = vrot.slane %v1655_v22, %v2155_v10  ;;  %v768_v47 = vrot.slane %v1655_v22, %v2157_v11 }
  0x92   : >> { %v733_v51 = vmul.f32 %v726_v49, %v2231_v32  ;;  %v734_v52 = vmul.f32 %v730_v62, %v2233_v33  ;;  %v750_v53 = vmul.f32 %v743_v63, %v2235_v34  ;;  %v751_v5 = vmul.f32 %v747_v42, %v2237_v35 }
  0x93   : >> { %v718_v12 = vadd.f32 %v716_v39, %v701_v43  ;;  %v719_v13 = vadd.f32 %v717_v46, %v702_v7  ;;  %v771_v30 = vmul.f32 %v764_v55, %v2203_v14  ;;  %v772_v8 = vmul.f32 %v768_v47, %v2205_v15  ;;  %v1659_v46 = vld [vmem:[%s2201_s15 + $0x64] ss:$8 sm:$0x3]  ;;  %v1660_v43 = vld [vmem:[%s2201_s15 + $0x65] ss:$8 sm:$0x3] }
  0x94   : >> { %v779_v9 = vrot.slane %v1656_v48, %v2155_v10  ;;  %v783_v31 = vrot.slane %v1656_v48, %v2157_v11  ;;  %v796_v60 = vrot.slane %v1657_v50, %v2155_v10  ;;  %v800_v61 = vrot.slane %v1657_v50, %v2157_v11 }
  0x95   : >> { %v735_v22 = vadd.f32 %v733_v51, %v718_v12  ;;  %v736_v23 = vadd.f32 %v734_v52, %v719_v13  ;;  %v813_v38 = vrot.slane %v1658_v6, %v2155_v10  ;;  %v817_v39 = vrot.slane %v1658_v6, %v2157_v11 }
  0x96   : >> { %v786_v49 = vmul.f32 %v779_v9, %v2207_v16  ;;  %v787_v62 = vmul.f32 %v783_v31, %v2209_v17  ;;  %v803_v63 = vmul.f32 %v796_v60, %v2211_v18  ;;  %v804_v42 = vmul.f32 %v800_v61, %v2213_v19 }
  0x97   : >> { %v752_v7 = vadd.f32 %v750_v53, %v735_v22  ;;  %v753_v55 = vadd.f32 %v751_v5, %v736_v23  ;;  %v820_v47 = vmul.f32 %v813_v38, %v2215_v20  ;;  %v821_v48 = vmul.f32 %v817_v39, %v2217_v21  ;;  %v1661_v53 = vld [vmem:[%s2201_s15 + $0x66] ss:$8 sm:$0x3] }
  0x98   : >> { %v788_v50 = vadd.f32 %v786_v49, %v771_v30  ;;  %v789_v51 = vadd.f32 %v787_v62, %v772_v8  ;;  %v830_v52 = vrot.slane %v1659_v46, %v2155_v10  ;;  %v834_v6 = vrot.slane %v1659_v46, %v2157_v11  ;;  %v1662_v30 = vld [vmem:[%s2201_s15 + $0x67] ss:$8 sm:$0x3]  ;;  %v1663_v8 = vld [vmem:[%s2201_s15 + $0x80] ss:$8 sm:$0x3] }
  0x99   : >> { %v618_v12 = vadd.f32 %v616_v36, %v480_v45  ;;  %v619_v13 = vadd.f32 %v617_v37, %v481_v4  ;;  %v847_v9 = vrot.slane %v1660_v43, %v2155_v10  ;;  %v851_v31 = vrot.slane %v1660_v43, %v2157_v11 }
  0x9a   : >> { %v805_v5 = vadd.f32 %v803_v63, %v788_v50  ;;  %v806_v60 = vadd.f32 %v804_v42, %v789_v51  ;;  %v837_v61 = vmul.f32 %v830_v52, %v2221_v24  ;;  %v838_v22 = vmul.f32 %v834_v6, %v2223_v25  ;;  %v1664_v63 = vld [vmem:[%s2201_s15 + $0x81] ss:$8 sm:$0x3] }
  0x9b   : >> { %v754_v23 = vmul.f32 %v752_v7, %v2188_v0  ;;  %v755_v38 = vmul.f32 %v753_v55, %v2191_v1  ;;  %v854_v45 = vmul.f32 %v847_v9, %v2225_v26  ;;  %v855_v4 = vmul.f32 %v851_v31, %v2227_v27 }
  0x9c   : >> { %v822_v36 = vadd.f32 %v820_v47, %v805_v5  ;;  %v823_v37 = vadd.f32 %v821_v48, %v806_v60  ;;  %v864_v39 = vrot.slane %v1661_v53, %v2155_v10  ;;  %v868_v46 = vrot.slane %v1661_v53, %v2157_v11  ;;  %v1665_v47 = vld [vmem:[%s2201_s15 + $0x82] ss:$8 sm:$0x3]  ;;  %v1666_v48 = vld [vmem:[%s2201_s15 + $0x83] ss:$8 sm:$0x3] }
  0x9d   : >> { %v881_v49 = vrot.slane %v1662_v30, %v2155_v10  ;;  %v885_v62 = vrot.slane %v1662_v30, %v2157_v11  ;;  %v902_v0 = vrot.slane %v1663_v8, %v2155_v10  ;;  %v906_v1 = vrot.slane %v1663_v8, %v2157_v11 }
  0x9e   : >> { %v839_v42 = vadd.f32 %v837_v61, %v822_v36  ;;  %v840_v43 = vadd.f32 %v838_v22, %v823_v37  ;;  %v871_v7 = vmul.f32 %v864_v39, %v2231_v32  ;;  %v872_v55 = vmul.f32 %v868_v46, %v2233_v33 }
  0x9f   : >> { %v888_v50 = vmul.f32 %v881_v49, %v2235_v34  ;;  %v889_v51 = vmul.f32 %v885_v62, %v2237_v35  ;;  %v909_v52 = vmul.f32 %v902_v0, %v2203_v14  ;;  %v910_v6 = vmul.f32 %v906_v1, %v2205_v15 }
  0xa0   : >> { %v856_v9 = vadd.f32 %v854_v45, %v839_v42  ;;  %v857_v31 = vadd.f32 %v855_v4, %v840_v43  ;;  %v917_v53 = vrot.slane %v1664_v63, %v2155_v10  ;;  %v921_v5 = vrot.slane %v1664_v63, %v2157_v11  ;;  %v1667_v45 = vld [vmem:[%s2201_s15 + $0x84] ss:$8 sm:$0x3]  ;;  %v1668_v4 = vld [vmem:[%s2201_s15 + $0x85] ss:$8 sm:$0x3] }
  0xa1   : >> { %v934_v60 = vrot.slane %v1665_v47, %v2155_v10  ;;  %v938_v61 = vrot.slane %v1665_v47, %v2157_v11  ;;  %v951_v22 = vrot.slane %v1666_v48, %v2155_v10  ;;  %v955_v30 = vrot.slane %v1666_v48, %v2157_v11 }
  0xa2   : >> { %v873_v8 = vadd.f32 %v871_v7, %v856_v9  ;;  %v874_v36 = vadd.f32 %v872_v55, %v857_v31  ;;  %v924_v37 = vmul.f32 %v917_v53, %v2207_v16  ;;  %v925_v39 = vmul.f32 %v921_v5, %v2209_v17 }
  0xa3   : >> { %v941_v46 = vmul.f32 %v934_v60, %v2211_v18  ;;  %v942_v49 = vmul.f32 %v938_v61, %v2213_v19  ;;  %v958_v62 = vmul.f32 %v951_v22, %v2215_v20  ;;  %v959_v0 = vmul.f32 %v955_v30, %v2217_v21  ;;  %v1669_v60 = vld [vmem:[%s2201_s15 + $0x86] ss:$8 sm:$0x3]  ;;  %v1670_v61 = vld [vmem:[%s2201_s15 + $0x87] ss:$8 sm:$0x3] }
  0xa4   : >> { %v890_v1 = vadd.f32 %v888_v50, %v873_v8  ;;  %v891_v63 = vadd.f32 %v889_v51, %v874_v36  ;;  %v926_v42 = vadd.f32 %v924_v37, %v909_v52  ;;  %v927_v43 = vadd.f32 %v925_v39, %v910_v6  ;;  %v1671_v22 = vld [vmem:[%s2201_s15 + $0xa0] ss:$8 sm:$0x3] }
  0xa5   : >> { %v968_v7 = vrot.slane %v1667_v45, %v2155_v10  ;;  %v972_v55 = vrot.slane %v1667_v45, %v2157_v11  ;;  %v985_v47 = vrot.slane %v1668_v4, %v2155_v10  ;;  %v989_v48 = vrot.slane %v1668_v4, %v2157_v11  ;;  %v1672_v4 = vld [vmem:[%s2201_s15 + $0xa1] ss:$8 sm:$0x3] }
  0xa6   : >> { %v756_v9 = vadd.f32 %v754_v23, %v618_v12  ;;  %v757_v31 = vadd.f32 %v755_v38, %v619_v13  ;;  %v943_v53 = vadd.f32 %v941_v46, %v926_v42  ;;  %v944_v5 = vadd.f32 %v942_v49, %v927_v43  ;;  %v1673_v46 = vld [vmem:[%s2201_s15 + $0xa2] ss:$8 sm:$0x3] }
  0xa7   : >> { %v892_v50 = vmul.f32 %v890_v1, %v2194_v2  ;;  %v893_v51 = vmul.f32 %v891_v63, %v2197_v3  ;;  %v975_v52 = vmul.f32 %v968_v7, %v2221_v24  ;;  %v976_v6 = vmul.f32 %v972_v55, %v2223_v25  ;;  %v1674_v63 = vld [vmem:[%s2201_s15 + $0xa3] ss:$8 sm:$0x3] }
  0xa8   : >> { %v960_v30 = vadd.f32 %v958_v62, %v943_v53  ;;  %v961_v8 = vadd.f32 %v959_v0, %v944_v5  ;;  %v992_v12 = vmul.f32 %v985_v47, %v2225_v26  ;;  %v993_v13 = vmul.f32 %v989_v48, %v2227_v27 }
  0xa9   : >> { %v1002_v23 = vrot.slane %v1669_v60, %v2155_v10  ;;  %v1006_v2 = vrot.slane %v1669_v60, %v2157_v11  ;;  %v1019_v3 = vrot.slane %v1670_v61, %v2155_v10  ;;  %v1023_v38 = vrot.slane %v1670_v61, %v2157_v11 }
  0xaa   : >> { %v977_v36 = vadd.f32 %v975_v52, %v960_v30  ;;  %v978_v37 = vadd.f32 %v976_v6, %v961_v8  ;;  %v1040_v39 = vrot.slane %v1671_v22, %v2155_v10  ;;  %v1044_v45 = vrot.slane %v1671_v22, %v2157_v11  ;;  %v1675_v22 = vld [vmem:[%s2201_s15 + $0xa4] ss:$8 sm:$0x3] }
  0xab   : >> { %v1009_v49 = vmul.f32 %v1002_v23, %v2231_v32  ;;  %v1010_v62 = vmul.f32 %v1006_v2, %v2233_v33  ;;  %v1026_v0 = vmul.f32 %v1019_v3, %v2235_v34  ;;  %v1027_v1 = vmul.f32 %v1023_v38, %v2237_v35 }
  0xac   : >> { %v994_v42 = vadd.f32 %v992_v12, %v977_v36  ;;  %v995_v43 = vadd.f32 %v993_v13, %v978_v37  ;;  %v1047_v7 = vmul.f32 %v1040_v39, %v2203_v14  ;;  %v1048_v55 = vmul.f32 %v1044_v45, %v2205_v15  ;;  %v1676_v36 = vld [vmem:[%s2201_s15 + $0xa5] ss:$8 sm:$0x3] }
  0xad   : >> { %v1055_v47 = vrot.slane %v1672_v4, %v2155_v10  ;;  %v1059_v48 = vrot.slane %v1672_v4, %v2157_v11  ;;  %v1072_v53 = vrot.slane %v1673_v46, %v2155_v10  ;;  %v1076_v5 = vrot.slane %v1673_v46, %v2157_v11 }
  0xae   : >> { %v1011_v60 = vadd.f32 %v1009_v49, %v994_v42  ;;  %v1012_v61 = vadd.f32 %v1010_v62, %v995_v43  ;;  %v1089_v52 = vrot.slane %v1674_v63, %v2155_v10  ;;  %v1093_v6 = vrot.slane %v1674_v63, %v2157_v11 }
  0xaf   : >> { %v1062_v30 = vmul.f32 %v1055_v47, %v2207_v16  ;;  %v1063_v8 = vmul.f32 %v1059_v48, %v2209_v17  ;;  %v1079_v12 = vmul.f32 %v1072_v53, %v2211_v18  ;;  %v1080_v13 = vmul.f32 %v1076_v5, %v2213_v19  ;;  %v1678_v48 = vld [vmem:[%s2201_s15 + $0xa7] ss:$8 sm:$0x3] }
  0xb0   : >> { %v1028_v23 = vadd.f32 %v1026_v0, %v1011_v60  ;;  %v1029_v2 = vadd.f32 %v1027_v1, %v1012_v61  ;;  %v1096_v3 = vmul.f32 %v1089_v52, %v2215_v20  ;;  %v1097_v38 = vmul.f32 %v1093_v6, %v2217_v21  ;;  %v1680_v61 = vld [vmem:[%s2201_s15 + $0xc1] ss:$8 sm:$0x3] }
  0xb1   : >> { %v1064_v37 = vadd.f32 %v1062_v30, %v1047_v7  ;;  %v1065_v39 = vadd.f32 %v1063_v8, %v1048_v55  ;;  %v1106_v45 = vrot.slane %v1675_v22, %v2155_v10  ;;  %v1110_v4 = vrot.slane %v1675_v22, %v2157_v11  ;;  %v1679_v7 = vld [vmem:[%s2201_s15 + $0xc0] ss:$8 sm:$0x3]  ;;  %v1681_v22 = vld [vmem:[%s2201_s15 + $0xc2] ss:$8 sm:$0x3] }
  0xb2   : >> { %v894_v46 = vadd.f32 %v892_v50, %v756_v9  ;;  %v895_v49 = vadd.f32 %v893_v51, %v757_v31  ;;  %v1030_v62 = vmul.f32 %v1028_v23, %v2301_v54  ;;  %v1031_v0 = vmul.f32 %v1029_v2, %v2305_v44  ;;  %v1677_v31 = vld [vmem:[%s2201_s15 + $0xa6] ss:$8 sm:$0x3]  ;;  %v1682_v30 = vld [vmem:[%s2201_s15 + $0xc3] ss:$8 sm:$0x3] }
  0xb3   : >> { %v1081_v1 = vadd.f32 %v1079_v12, %v1064_v37  ;;  %v1082_v63 = vadd.f32 %v1080_v13, %v1065_v39  ;;  %v1123_v42 = vrot.slane %v1676_v36, %v2155_v10  ;;  %v1127_v43 = vrot.slane %v1676_v36, %v2157_v11 }
  0xb4   : >> { %v2482_v55 = vmul.f32 %v2167_v56, %v2163_v40  ;;  %v2486_v9 = vmul.f32 %v2169_v57, %v2165_v41  ;;  %v1113_v54 = vmul.f32 %v1106_v45, %v2221_v24  ;;  %v1114_v44 = vmul.f32 %v1110_v4, %v2223_v25 }
  0xb5   : >> { %v2493_v50 = vmul.f32 %v2171_v58, %v2159_v28  ;;  %v2497_v51 = vmul.f32 %v2173_v59, %v2161_v29  ;;  %v1098_v56 = vadd.f32 %v1096_v3, %v1081_v1  ;;  %v1099_v47 = vadd.f32 %v1097_v38, %v1082_v63  ;;  %v1683_v1 = vld [vmem:[%s2201_s15 + $0xc4] ss:$8 sm:$0x3]  ;;  %v1684_v63 = vld [vmem:[%s2201_s15 + $0xc5] ss:$8 sm:$0x3] }
  0xb6   : >> { %v2500_v57 = vadd.f32 %v1030_v62, %v894_v46  ;;  %v2502_v53 = vadd.f32 %v1031_v0, %v895_v49  ;;  %v1178_v5 = vrot.slane %v1679_v7, %v2155_v10  ;;  %v1182_v60 = vrot.slane %v1679_v7, %v2157_v11 }
  0xb7   : >> { %v1130_v52 = vmul.f32 %v1123_v42, %v2225_v26  ;;  %v1131_v28 = vmul.f32 %v1127_v43, %v2227_v27  ;;  %v1140_v6 = vrot.slane %v1677_v31, %v2155_v10  ;;  %v1144_v29 = vrot.slane %v1677_v31, %v2157_v11 }
  0xb8   : >> { %v1115_v8 = vadd.f32 %v1113_v54, %v1098_v56  ;;  %v1116_v12 = vadd.f32 %v1114_v44, %v1099_v47  ;;  %v1157_v13 = vrot.slane %v1678_v48, %v2155_v10  ;;  %v1161_v23 = vrot.slane %v1678_v48, %v2157_v11 }
  0xb9   : >> { %v1185_v2 = vmul.f32 %v1178_v5, %v2203_v14  ;;  %v1186_v3 = vmul.f32 %v1182_v60, %v2205_v15  ;;  %v1193_v38 = vrot.slane %v1680_v61, %v2155_v10  ;;  %v1197_v36 = vrot.slane %v1680_v61, %v2157_v11 }
  0xba   : >> { %v1210_v37 = vrot.slane %v1681_v22, %v2155_v10  ;;  %v1214_v39 = vrot.slane %v1681_v22, %v2157_v11  ;;  %v1227_v45 = vrot.slane %v1682_v30, %v2155_v10  ;;  %v1231_v4 = vrot.slane %v1682_v30, %v2157_v11  ;;  %v1685_v22 = vld [vmem:[%s2201_s15 + $0xc6] ss:$8 sm:$0x3]  ;;  %v1686_v30 = vld [vmem:[%s2201_s15 + $0xc7] ss:$8 sm:$0x3] }
  0xbb   : >> { %v1147_v46 = vmul.f32 %v1140_v6, %v2231_v32  ;;  %v1148_v49 = vmul.f32 %v1144_v29, %v2233_v33  ;;  %v1200_v62 = vmul.f32 %v1193_v38, %v2207_v16  ;;  %v1201_v0 = vmul.f32 %v1197_v36, %v2209_v17  ;;  %v1687_v38 = vld [vmem:[%s2201_s15 + $0xe0] ss:$8 sm:$0x3] }
  0xbc   : >> { %v1132_v42 = vadd.f32 %v1130_v52, %v1115_v8  ;;  %v1133_v43 = vadd.f32 %v1131_v28, %v1116_v12  ;;  %v1217_v7 = vmul.f32 %v1210_v37, %v2211_v18  ;;  %v1218_v54 = vmul.f32 %v1214_v39, %v2213_v19 }
  0xbd   : >> { %v1202_v44 = vadd.f32 %v1200_v62, %v1185_v2  ;;  %v1203_v31 = vadd.f32 %v1201_v0, %v1186_v3  ;;  %v1234_v56 = vmul.f32 %v1227_v45, %v2215_v20  ;;  %v1235_v47 = vmul.f32 %v1231_v4, %v2217_v21 }
  0xbe   : >> { %v1244_v48 = vrot.slane %v1683_v1, %v2155_v10  ;;  %v1248_v5 = vrot.slane %v1683_v1, %v2157_v11  ;;  %v1261_v60 = vrot.slane %v1684_v63, %v2155_v10  ;;  %v1265_v61 = vrot.slane %v1684_v63, %v2157_v11  ;;  %v1688_v63 = vld [vmem:[%s2201_s15 + $0xe1] ss:$8 sm:$0x3] }
  0xbf   : >> { %v1164_v52 = vmul.f32 %v1157_v13, %v2235_v34  ;;  %v1165_v28 = vmul.f32 %v1161_v23, %v2237_v35  ;;  %v1219_v6 = vadd.f32 %v1217_v7, %v1202_v44  ;;  %v1220_v29 = vadd.f32 %v1218_v54, %v1203_v31  ;;  %v1690_v31 = vld [vmem:[%s2201_s15 + $0xe3] ss:$8 sm:$0x3] }
  0xc0   : >> { %v1149_v8 = vadd.f32 %v1147_v46, %v1132_v42  ;;  %v1150_v12 = vadd.f32 %v1148_v49, %v1133_v43  ;;  %v1251_v2 = vmul.f32 %v1244_v48, %v2221_v24  ;;  %v1252_v3 = vmul.f32 %v1248_v5, %v2223_v25  ;;  %v1689_v42 = vld [vmem:[%s2201_s15 + $0xe2] ss:$8 sm:$0x3] }
  0xc1   : >> { %v1236_v36 = vadd.f32 %v1234_v56, %v1219_v6  ;;  %v1237_v37 = vadd.f32 %v1235_v47, %v1220_v29  ;;  %v1268_v39 = vmul.f32 %v1261_v60, %v2225_v26  ;;  %v1269_v13 = vmul.f32 %v1265_v61, %v2227_v27 }
  0xc2   : >> { %v1278_v23 = vrot.slane %v1685_v22, %v2155_v10  ;;  %v1282_v45 = vrot.slane %v1685_v22, %v2157_v11  ;;  %v1295_v4 = vrot.slane %v1686_v30, %v2155_v10  ;;  %v1299_v46 = vrot.slane %v1686_v30, %v2157_v11 }
  0xc3   : >> { %v1253_v49 = vadd.f32 %v1251_v2, %v1236_v36  ;;  %v1254_v62 = vadd.f32 %v1252_v3, %v1237_v37  ;;  %v1316_v0 = vrot.slane %v1687_v38, %v2155_v10  ;;  %v1320_v1 = vrot.slane %v1687_v38, %v2157_v11  ;;  %v1692_v3 = vld [vmem:[%s2201_s15 + $0xe5] ss:$8 sm:$0x3] }
  0xc4   : >> { %v1166_v43 = vadd.f32 %v1164_v52, %v1149_v8  ;;  %v1167_v7 = vadd.f32 %v1165_v28, %v1150_v12  ;;  %v1285_v54 = vmul.f32 %v1278_v23, %v2231_v32  ;;  %v1286_v44 = vmul.f32 %v1282_v45, %v2233_v33  ;;  %v1691_v8 = vld [vmem:[%s2201_s15 + $0xe4] ss:$8 sm:$0x3] }
  0xc5   : >> { %v1270_v56 = vadd.f32 %v1268_v39, %v1253_v49  ;;  %v1271_v47 = vadd.f32 %v1269_v13, %v1254_v62  ;;  %v1323_v48 = vmul.f32 %v1316_v0, %v2203_v14  ;;  %v1324_v5 = vmul.f32 %v1320_v1, %v2205_v15  ;;  %v1694_v0 = vld [vmem:[%s2201_s15 + $0xe7] ss:$8 sm:$0x3] }
  0xc6   : >> { %v1331_v60 = vrot.slane %v1688_v63, %v2155_v10  ;;  %v1335_v61 = vrot.slane %v1688_v63, %v2157_v11  ;;  %v1348_v52 = vrot.slane %v1689_v42, %v2155_v10  ;;  %v1352_v28 = vrot.slane %v1689_v42, %v2157_v11 }
  0xc7   : >> { %v1302_v6 = vmul.f32 %v1295_v4, %v2235_v34  ;;  %v1303_v29 = vmul.f32 %v1299_v46, %v2237_v35  ;;  %v1365_v22 = vrot.slane %v1690_v31, %v2155_v10  ;;  %v1369_v30 = vrot.slane %v1690_v31, %v2157_v11  ;;  %v1693_v46 = vld [vmem:[%s2201_s15 + $0xe6] ss:$8 sm:$0x3] }
  0xc8   : >> { %v1338_v14 = vmul.f32 %v1331_v60, %v2207_v16  ;;  %v1339_v15 = vmul.f32 %v1335_v61, %v2209_v17  ;;  %v1355_v12 = vmul.f32 %v1348_v52, %v2211_v18  ;;  %v1356_v2 = vmul.f32 %v1352_v28, %v2213_v19 }
  0xc9   : >> { %v1287_v38 = vadd.f32 %v1285_v54, %v1270_v56  ;;  %v1288_v36 = vadd.f32 %v1286_v44, %v1271_v47  ;;  %v1372_v37 = vmul.f32 %v1365_v22, %v2215_v20  ;;  %v1373_v39 = vmul.f32 %v1369_v30, %v2217_v21 }
  0xca   : >> { %v1340_v13 = vadd.f32 %v1338_v14, %v1323_v48  ;;  %v1341_v23 = vadd.f32 %v1339_v15, %v1324_v5  ;;  %v1382_v45 = vrot.slane %v1691_v8, %v2155_v10  ;;  %v1386_v16 = vrot.slane %v1691_v8, %v2157_v11 }
  0xcb   : >> { %v1168_v17 = vmul.f32 %v1166_v43, %v2482_v55  ;;  %v1169_v18 = vmul.f32 %v1167_v7, %v2486_v9  ;;  %v1399_v19 = vrot.slane %v1692_v3, %v2155_v10  ;;  %v1403_v4 = vrot.slane %v1692_v3, %v2157_v11 }
  0xcc   : >> { %v1357_v49 = vadd.f32 %v1355_v12, %v1340_v13  ;;  %v1358_v62 = vadd.f32 %v1356_v2, %v1341_v23  ;;  %v1389_v20 = vmul.f32 %v1382_v45, %v2221_v24  ;;  %v1390_v21 = vmul.f32 %v1386_v16, %v2223_v25 }
  0xcd   : >> { %v1304_v1 = vadd.f32 %v1302_v6, %v1287_v38  ;;  %v1305_v63 = vadd.f32 %v1303_v29, %v1288_v36  ;;  %v1406_v42 = vmul.f32 %v1399_v19, %v2225_v26  ;;  %v1407_v55 = vmul.f32 %v1403_v4, %v2227_v27 }
  0xce   : >> { %v1374_v43 = vadd.f32 %v1372_v37, %v1357_v49  ;;  %v1375_v9 = vadd.f32 %v1373_v39, %v1358_v62  ;;  %v1416_v7 = vrot.slane %v1693_v46, %v2155_v10  ;;  %v1420_v54 = vrot.slane %v1693_v46, %v2157_v11 }
  0xcf   : >> { %v1433_v44 = vrot.slane %v1694_v0, %v2155_v10  ;;  %v1437_v31 = vrot.slane %v1694_v0, %v2157_v11  ;;  %v1170_v26 = vadd.f32 %v1168_v17, %v2500_v57  ;;  %v1171_v27 = vadd.f32 %v1169_v18, %v2502_v53 }
  0xd0   : >> { %v1391_v24 = vadd.f32 %v1389_v20, %v1374_v43  ;;  %v1392_v56 = vadd.f32 %v1390_v21, %v1375_v9  ;;  %v1423_v25 = vmul.f32 %v1416_v7, %v2231_v32  ;;  %v1424_v47 = vmul.f32 %v1420_v54, %v2233_v33 }
  0xd1   : >> { %v1306_v48 = vmul.f32 %v1304_v1, %v2493_v50  ;;  %v1307_v5 = vmul.f32 %v1305_v63, %v2497_v51  ;;  %v1440_v11 = vmul.f32 %v1433_v44, %v2235_v34  ;;  %v1441_v61 = vmul.f32 %v1437_v31, %v2237_v35 }
  0xd2   : >> { %v1408_v60 = vadd.f32 %v1406_v42, %v1391_v24  ;;  %v1409_v10 = vadd.f32 %v1407_v55, %v1392_v56  ;;  %v319_v32 = vmul.f32 %v2171_v58, %v2163_v40  ;;  %v320_v33 = vmul.f32 %v2173_v59, %v2165_v41 }
  0xd3   : >> { %v1308_v52 = vadd.f32 %v1306_v48, %v1170_v26  ;;  %v1309_v50 = vadd.f32 %v1307_v5, %v1171_v27 }
  0xd4   : >> { %v1425_v57 = vadd.f32 %v1423_v25, %v1408_v60  ;;  %v1426_v53 = vadd.f32 %v1424_v47, %v1409_v10 }
  0xd6   : >> { %v1442_v28 = vadd.f32 %v1440_v11, %v1425_v57  ;;  %v1443_v6 = vadd.f32 %v1441_v61, %v1426_v53  ;;  %227 = sbr.rel (!%p225_p0) target bundleno = 88 (0x58), region = 164 }
  0xd8   : >> { %v1444_v29 = vmul.f32 %v1442_v28, %v319_v32  ;;  %v1445_v51 = vmul.f32 %v1443_v6, %v320_v33 }
  0xda   : >> { %v1446_v22 = vadd.f32 %v1444_v29, %v1308_v52  ;;  %v1447_v30 = vadd.f32 %v1445_v51, %v1309_v50 }
  0xdc   : >> { %1450 = vst [vmem:[%s1449_s26] sm:$0xff] %v1446_v22  ;;  %1451 = vst [vmem:[%s1449_s26 + $0x8] sm:$0xff] %v1447_v30 }
  0xdd   : > { %1857 = shalt.err (!%p1854_p4)
}
  0xde   : > { %s1858_s12 = scalar_lea.hbm %s2612_s18, 512  ;;  %s1862_s16 = scalar_lea.hbm %s2658_s2, 1024 }
  0xdf   : > { %p1859_p10 = scmp.ne.s32.totalorder %s2612_s18, %s1858_s12  ;;  %p1863_p5 = scmp.lt.u32.totalorder %s2612_s18, %s2658_s2 }
  0xe0   : > { %p1864_p8 = scmp.lt.u32.totalorder %s1862_s16, %s1858_s12  ;;  %p1866_p2 = scmp.lt.u32.totalorder %s1858_s12, %s2612_s18 }
  0xe1   : > { %p1860_p1 = pnand %p1859_p10, %p2668_p12 }
  0xe2   : > { %p1865_p0 = por %p1864_p8, %p1863_p5 }
  0xe3   : > { %p1861_p3 = pneg %p1860_p1 }
  0xe4   : > { %p1867_p13 = por %p1866_p2, %p1865_p0 }
  0xe6   : > { %p1868_p6 = pnand %p1867_p13, %p1861_p3 }
  0xe8   : > { %1871 = shalt.err (!%p1868_p6)
}
  0xe9   : > { %1710 = dma.vmem_to_hbm [thread:$0]  (%p2668_p12), %s1470_s25, 512, %s2612_s18, %s1453_s4  }
  0xea PF: > { %s1481_s21 = sand.u32 1, %s1914_s9   ;;  %p2669_p7 = scmp.ne.s32.totalorder %s2664_s24, 0 }
  0xeb   : > { %p2670_p9 = scmp.ge.s32.totalorder %s1934_s14, 2  ;;  %s1482_s15 = scalar_lea.sflag [#allocation4], %s1481_s21 }
  0xed   : > { %p1720_p11 = pnand %p2670_p9, %p2669_p7 }
  0xef   : > { %1909 = dma.done.wait (!%p1720_p11), %s1482_s15, 512  }
  0xf0   : > { %1911 = vsyncadd (!%p1720_p11), %s1482_s15, 4294966784  ;;  %s21_s14 = sadd.s32 1, %s1934_s14   ;;  %s2671_s9 = smov %s1918_s10 }
  0xf1   : > { %p18_p4 = scmp.ge.s32.totalorder %s21_s14, 4   ;;  %s2672_s10 = smov %s1922_s11 }
  0xf2   : > { %s2673_s11 = smov %s2017_s23  ;;  %s2674_s12 = smov %s1930_s13 }
  0xf3   : > { %s2675_s13 = smov %s2677_s17  ;;  %20 = sbr.rel (!%p18_p4) target bundleno = 8 (0x8), region = 175 }
  0xfa   :  { %1487 = vsyncpa [#allocation3], 1 }
  0xfb   :  { %1489 = vsyncpa [#allocation3 + $0x1], 1 }
  0xfc   :  { %1490 = vsyncpa [#allocation6], 1 }
  0xfd   :  { %1492 = vsyncpa [#allocation6 + $0x1], 1 }
  0xfe   :  { %1493 = vsyncpa [#allocation4], 1 }
  0xff   :  { %1495 = vsyncpa [#allocation4 + $0x1], 1 }

</bundles_post_ra>
